<compile_context>
chip_gen: v7x
topology: tpu7x:2x2x1
jax: 0.10.0
libtpu: 0.0.40
codegen_flags: <defaults>
</compile_context>

<pallas_src>
import jax
import jax.numpy as jnp
from jax import lax
from jax.experimental import pallas as pl
from jax.experimental.pallas import tpu as pltpu

# ----------------------------- configuration -------------------------------
IMG = 32          # input image height/width
PATCH = 16        # patch size (as in vit_b_16)
C_IN = 3          # RGB
HIDDEN = 64       # hidden_dim (768 in vit_b_16; scaled down)
HEADS = 4
HEAD_DIM = HIDDEN // HEADS
MLP_DIM = 128     # mlp_dim (3072 in vit_b_16; scaled down)
LAYERS = 2        # num transformer layers (12 in vit_b_16; scaled down)
LN_EPS = 1e-6     # torchvision uses nn.LayerNorm(..., eps=1e-6)

GH = IMG // PATCH
NUM_PATCHES = GH * GH          # 4
SEQ = NUM_PATCHES + 1          # 5 (CLS + patches)
S_PAD = 8                      # padded sequence (sublane multiple; 197->256 at real scale)
PDIM = C_IN * PATCH * PATCH    # 768
N_LAYER_W = 12
NEG_INF = -1e30

# whole-array VMEM resident (weights / biases); block index constant across grid
RESIDENT = pl.BlockSpec(memory_space=pltpu.MemorySpace.VMEM)


# ------------------------------ Pallas kernel -------------------------------
def _layernorm(v, w, b):
    mu = jnp.mean(v, axis=-1, keepdims=True)
    var = jnp.mean(jnp.square(v - mu), axis=-1, keepdims=True)
    return (v - mu) * lax.rsqrt(var + LN_EPS) * w + b


def _vit_kernel(*refs):
    """Whole ViT encoder forward for one image (one grid step), VMEM resident."""
    ctx_scr = refs[-1]                       # (S_PAD, HIDDEN) f32 scratch
    o_ref = refs[-2]                         # (1, S_PAD, HIDDEN)
    patches_ref, patch_w_ref, tok_bias_ref = refs[0:3]
    wrefs = refs[3:-2]
    layer_refs = [wrefs[i * N_LAYER_W:(i + 1) * N_LAYER_W] for i in range(LAYERS)]
    lnf_w_ref = wrefs[LAYERS * N_LAYER_W]
    lnf_b_ref = wrefs[LAYERS * N_LAYER_W + 1]

    # Key-padding mask generated in-kernel (cols >= SEQ are padding tokens).
    col = lax.broadcasted_iota(jnp.int32, (1, S_PAD), 1)
    kmask = jnp.where(col < SEQ, 0.0, NEG_INF).astype(jnp.float32)   # (1, S_PAD)

    # Patch embedding + class-token/conv-bias + positional embedding, fused.
    # Row 0 of patches is a zero vector (CLS); rows >= SEQ are zero padding.
    p = patches_ref[0].astype(jnp.bfloat16)                          # (S_PAD, PDIM)
    x = (jnp.dot(p, patch_w_ref[...], preferred_element_type=jnp.float32)
         + tok_bias_ref[...])                                        # (S_PAD, D) f32

    scale = 1.0 / float(HEAD_DIM) ** 0.5

    for lw in layer_refs:                                            # static unroll
        (ln1w, ln1b, qkvw, qkvb, projw, projb,
         ln2w, ln2b, w1, b1, w2, b2) = lw

        # ---- pre-LN multi-head self-attention ----
        y = _layernorm(x, ln1w[...], ln1b[...]).astype(jnp.bfloat16)
        qkv = (jnp.dot(y, qkvw[...], preferred_element_type=jnp.float32)
               + qkvb[...])                                          # (S_PAD, 3D) f32

        for h in range(HEADS):                                       # static unroll
            lo = h * HEAD_DIM
            qh = qkv[:, lo:lo + HEAD_DIM].astype(jnp.bfloat16)
            kh = qkv[:, HIDDEN + lo:HIDDEN + lo + HEAD_DIM].astype(jnp.bfloat16)
            vh = qkv[:, 2 * HIDDEN + lo:2 * HIDDEN + lo + HEAD_DIM].astype(jnp.bfloat16)
            # q @ k^T via dot_general contracting last dims (no explicit transpose)
            s = lax.dot_general(qh, kh, (((1,), (1,)), ((), ())),
                                preferred_element_type=jnp.float32)
            s = s * scale + kmask                                    # (S_PAD, S_PAD) f32
            s = s - jnp.max(s, axis=-1, keepdims=True)
            pr = jnp.exp(s)
            pr = pr / jnp.sum(pr, axis=-1, keepdims=True)            # exact softmax
            # write this head's context at its column offset (head concat)
            ctx_scr[:, lo:lo + HEAD_DIM] = jnp.dot(
                pr.astype(jnp.bfloat16), vh, preferred_element_type=jnp.float32)

        # single full-K output projection over the concatenated heads
        ctx = ctx_scr[...].astype(jnp.bfloat16)                      # (S_PAD, D)
        attn = (jnp.dot(ctx, projw[...], preferred_element_type=jnp.float32)
                + projb[...])
        x = x + attn                                                 # residual 1

        # ---- MLP block with exact (erf) GELU, f32 elementwise ----
        y2 = _layernorm(x, ln2w[...], ln2b[...]).astype(jnp.bfloat16)
        h1 = (jnp.dot(y2, w1[...], preferred_element_type=jnp.float32)
              + b1[...])
        g = 0.5 * h1 * (1.0 + lax.erf(h1 * 0.7071067811865476))      # torch nn.GELU()
        mlp = (jnp.dot(g.astype(jnp.bfloat16), w2[...],
                       preferred_element_type=jnp.float32) + b2[...])
        x = x + mlp                                                  # residual 2

    # Final LayerNorm (CLS row is row 0; wrapper extracts it).
    o_ref[0] = _layernorm(x, lnf_w_ref[...], lnf_b_ref[...]).astype(o_ref.dtype)


# ------------------------------ wrapper -------------------------------------
def vit_encoder_forward(x_nchw, params):
    """Equivalent of ViTEncoder.forward (heads=Identity -> CLS features)."""
    B = x_nchw.shape[0]

    # -- _process_input: 16x16/stride16 conv == unfold (layout glue only) --
    patches = x_nchw.reshape(B, C_IN, GH, PATCH, GH, PATCH)
    patches = patches.transpose(0, 2, 4, 1, 3, 5).reshape(B, NUM_PATCHES, PDIM)
    patches_in = jnp.zeros((B, S_PAD, PDIM), jnp.float32)
    patches_in = lax.dynamic_update_slice(patches_in, patches, (0, 1, 0))

    # Per-token additive term, shared across batch (NOT tiled by B):
    # row 0: cls_token + pos_emb[0]; rows 1..NP: conv bias + pos_emb[i]; pad rows 0.
    cls_row = params["cls_token"].reshape(1, HIDDEN) + params["pos_emb"][0, 0:1]
    patch_rows = params["patch_b"] + params["pos_emb"][0, 1:SEQ]
    pad_rows = jnp.zeros((S_PAD - SEQ, HIDDEN), jnp.float32)
    tok_bias = jnp.concatenate([cls_row, patch_rows, pad_rows], axis=0)  # (S_PAD, D)

    bf = lambda w: w.astype(jnp.bfloat16)   # bf16 weights: MXU-native, half the DMA

    inputs = [patches_in, bf(params["patch_w"]), tok_bias]
    for lp in params["layers"]:
        inputs += [lp["ln1_w"], lp["ln1_b"], bf(lp["qkv_w"]), lp["qkv_b"],
                   bf(lp["proj_w"]), lp["proj_b"], lp["ln2_w"], lp["ln2_b"],
                   bf(lp["mlp_w1"]), lp["mlp_b1"], bf(lp["mlp_w2"]), lp["mlp_b2"]]
    inputs += [params["ln_f_w"], params["ln_f_b"]]

    # Advisory cost estimate for XLA's scheduler.
    flops_layer = (2 * S_PAD * HIDDEN * 3 * HIDDEN                 # qkv
                   + HEADS * 2 * (2 * S_PAD * S_PAD * HEAD_DIM)    # scores + p@v
                   + 2 * S_PAD * HIDDEN * HIDDEN                   # out proj
                   + 2 * (2 * S_PAD * HIDDEN * MLP_DIM))           # mlp
    flops = B * (2 * S_PAD * PDIM * HIDDEN + LAYERS * flops_layer)
    transc = B * LAYERS * (HEADS * S_PAD * S_PAD + S_PAD * MLP_DIM)
    bytes_acc = (sum(int(a.size) * a.dtype.itemsize for a in inputs)
                 + B * S_PAD * HIDDEN * 4)

    out = pl.pallas_call(
        _vit_kernel,
        out_shape=jax.ShapeDtypeStruct((B, S_PAD, HIDDEN), jnp.float32),
        grid=(B,),
        in_specs=[pl.BlockSpec((1, S_PAD, PDIM), lambda b: (b, 0, 0))]
                 + [RESIDENT] * (len(inputs) - 1),
        out_specs=pl.BlockSpec((1, S_PAD, HIDDEN), lambda b: (b, 0, 0)),
        scratch_shapes=[pltpu.VMEM((S_PAD, HIDDEN), jnp.float32)],
        compiler_params=pltpu.CompilerParams(
            dimension_semantics=("parallel",),
            vmem_limit_bytes=32 << 20),
        cost_estimate=pl.CostEstimate(flops=flops, transcendentals=transc,
                                      bytes_accessed=bytes_acc),
    )(*inputs)
    return out[:, 0, :]                      # CLS features, (B, HIDDEN)


# --------------------------- deterministic params ---------------------------
# TODO(synk): torchvision's pretrained vit_b_16 weights cannot be loaded here
# (no file/network access); parameters are randomly initialized instead.
# TODO(synk): the requires_grad freezing in ViTEncoder is training-only and has
# no effect on the forward pass.
def init_params(key):
    ks = jax.random.split(key, 4 + LAYERS)
    std = 0.02
    params = {
        "patch_w": std * jax.random.normal(ks[0], (PDIM, HIDDEN), jnp.float32),
        "patch_b": jnp.zeros((1, HIDDEN), jnp.float32),
        "cls_token": std * jax.random.normal(ks[1], (1, 1, HIDDEN), jnp.float32),
        "pos_emb": std * jax.random.normal(ks[2], (1, SEQ, HIDDEN), jnp.float32),
        "ln_f_w": jnp.ones((1, HIDDEN), jnp.float32),
        "ln_f_b": jnp.zeros((1, HIDDEN), jnp.float32),
        "layers": [],
    }
    for i in range(LAYERS):
        lk = jax.random.split(ks[4 + i], 4)
        params["layers"].append({
            "ln1_w": jnp.ones((1, HIDDEN), jnp.float32),
            "ln1_b": jnp.zeros((1, HIDDEN), jnp.float32),
            # qkv_w laid out as [Wq | Wk | Wv] along the output dim
            # (transpose of torch's in_proj_weight).
            "qkv_w": std * jax.random.normal(lk[0], (HIDDEN, 3 * HIDDEN), jnp.float32),
            "qkv_b": jnp.zeros((1, 3 * HIDDEN), jnp.float32),
            "proj_w": std * jax.random.normal(lk[1], (HIDDEN, HIDDEN), jnp.float32),
            "proj_b": jnp.zeros((1, HIDDEN), jnp.float32),
            "ln2_w": jnp.ones((1, HIDDEN), jnp.float32),
            "ln2_b": jnp.zeros((1, HIDDEN), jnp.float32),
            "mlp_w1": std * jax.random.normal(lk[2], (HIDDEN, MLP_DIM), jnp.float32),
            "mlp_b1": jnp.zeros((1, MLP_DIM), jnp.float32),
            "mlp_w2": std * jax.random.normal(lk[3], (MLP_DIM, HIDDEN), jnp.float32),
            "mlp_b2": jnp.zeros((1, HIDDEN), jnp.float32),
        })
    return params


# ---------------------------------- main -------------------------------------
if __name__ == "__main__":
    key = jax.random.PRNGKey(0)
    pkey, xkey = jax.random.split(key)
    params = init_params(pkey)

    # NCHW input, as the PyTorch module expects.
    x = jax.random.normal(xkey, (2, C_IN, IMG, IMG), jnp.float32)

    fwd = jax.jit(vit_encoder_forward)
    out = jax.block_until_ready(fwd(x, params))

    assert out.shape == (2, HIDDEN), out.shape
    assert bool(jnp.all(jnp.isfinite(out)))
    print("KERNEL_OK")
</pallas_src>

<mosaic_0001>
module attributes {stable_mosaic.version = 11 : i64} {
  func.func @_vit_kernel(%arg0: i32, %arg1: memref<1x8x768xf32, #tpu.memory_space<vmem>>, %arg2: memref<768x64xbf16, #tpu.memory_space<vmem>>, %arg3: memref<8x64xf32, #tpu.memory_space<vmem>>, %arg4: memref<1x64xf32, #tpu.memory_space<vmem>>, %arg5: memref<1x64xf32, #tpu.memory_space<vmem>>, %arg6: memref<64x192xbf16, #tpu.memory_space<vmem>>, %arg7: memref<1x192xf32, #tpu.memory_space<vmem>>, %arg8: memref<64x64xbf16, #tpu.memory_space<vmem>>, %arg9: memref<1x64xf32, #tpu.memory_space<vmem>>, %arg10: memref<1x64xf32, #tpu.memory_space<vmem>>, %arg11: memref<1x64xf32, #tpu.memory_space<vmem>>, %arg12: memref<64x128xbf16, #tpu.memory_space<vmem>>, %arg13: memref<1x128xf32, #tpu.memory_space<vmem>>, %arg14: memref<128x64xbf16, #tpu.memory_space<vmem>>, %arg15: memref<1x64xf32, #tpu.memory_space<vmem>>, %arg16: memref<1x64xf32, #tpu.memory_space<vmem>>, %arg17: memref<1x64xf32, #tpu.memory_space<vmem>>, %arg18: memref<64x192xbf16, #tpu.memory_space<vmem>>, %arg19: memref<1x192xf32, #tpu.memory_space<vmem>>, %arg20: memref<64x64xbf16, #tpu.memory_space<vmem>>, %arg21: memref<1x64xf32, #tpu.memory_space<vmem>>, %arg22: memref<1x64xf32, #tpu.memory_space<vmem>>, %arg23: memref<1x64xf32, #tpu.memory_space<vmem>>, %arg24: memref<64x128xbf16, #tpu.memory_space<vmem>>, %arg25: memref<1x128xf32, #tpu.memory_space<vmem>>, %arg26: memref<128x64xbf16, #tpu.memory_space<vmem>>, %arg27: memref<1x64xf32, #tpu.memory_space<vmem>>, %arg28: memref<1x64xf32, #tpu.memory_space<vmem>>, %arg29: memref<1x64xf32, #tpu.memory_space<vmem>>, %arg30: memref<1x8x64xf32, #tpu.memory_space<vmem>>, %arg31: memref<8x64xf32, #tpu.memory_space<vmem>>) attributes {dimension_semantics = [#tpu.dimension_semantics<parallel>], iteration_bounds = array<i64: 2>, scalar_prefetch = 0 : i64, scratch_operands = 1 : i64, tpu.core_type = #tpu.core_type<tc>, window_params = [{transform_indices = @transform_0, window_bounds = array<i64: 1, 8, 768>}, {pipeline_mode = #tpu.pipeline_mode<synchronous>, transform_indices = @transform_1, window_bounds = array<i64: 768, 64>}, {pipeline_mode = #tpu.pipeline_mode<synchronous>, transform_indices = @transform_2, window_bounds = array<i64: 8, 64>}, {pipeline_mode = #tpu.pipeline_mode<synchronous>, transform_indices = @transform_3, window_bounds = array<i64: 1, 64>}, {pipeline_mode = #tpu.pipeline_mode<synchronous>, transform_indices = @transform_4, window_bounds = array<i64: 1, 64>}, {pipeline_mode = #tpu.pipeline_mode<synchronous>, transform_indices = @transform_5, window_bounds = array<i64: 64, 192>}, {pipeline_mode = #tpu.pipeline_mode<synchronous>, transform_indices = @transform_6, window_bounds = array<i64: 1, 192>}, {pipeline_mode = #tpu.pipeline_mode<synchronous>, transform_indices = @transform_7, window_bounds = array<i64: 64, 64>}, {pipeline_mode = #tpu.pipeline_mode<synchronous>, transform_indices = @transform_8, window_bounds = array<i64: 1, 64>}, {pipeline_mode = #tpu.pipeline_mode<synchronous>, transform_indices = @transform_9, window_bounds = array<i64: 1, 64>}, {pipeline_mode = #tpu.pipeline_mode<synchronous>, transform_indices = @transform_10, window_bounds = array<i64: 1, 64>}, {pipeline_mode = #tpu.pipeline_mode<synchronous>, transform_indices = @transform_11, window_bounds = array<i64: 64, 128>}, {pipeline_mode = #tpu.pipeline_mode<synchronous>, transform_indices = @transform_12, window_bounds = array<i64: 1, 128>}, {pipeline_mode = #tpu.pipeline_mode<synchronous>, transform_indices = @transform_13, window_bounds = array<i64: 128, 64>}, {pipeline_mode = #tpu.pipeline_mode<synchronous>, transform_indices = @transform_14, window_bounds = array<i64: 1, 64>}, {pipeline_mode = #tpu.pipeline_mode<synchronous>, transform_indices = @transform_15, window_bounds = array<i64: 1, 64>}, {pipeline_mode = #tpu.pipeline_mode<synchronous>, transform_indices = @transform_16, window_bounds = array<i64: 1, 64>}, {pipeline_mode = #tpu.pipeline_mode<synchronous>, transform_indices = @transform_17, window_bounds = array<i64: 64, 192>}, {pipeline_mode = #tpu.pipeline_mode<synchronous>, transform_indices = @transform_18, window_bounds = array<i64: 1, 192>}, {pipeline_mode = #tpu.pipeline_mode<synchronous>, transform_indices = @transform_19, window_bounds = array<i64: 64, 64>}, {pipeline_mode = #tpu.pipeline_mode<synchronous>, transform_indices = @transform_20, window_bounds = array<i64: 1, 64>}, {pipeline_mode = #tpu.pipeline_mode<synchronous>, transform_indices = @transform_21, window_bounds = array<i64: 1, 64>}, {pipeline_mode = #tpu.pipeline_mode<synchronous>, transform_indices = @transform_22, window_bounds = array<i64: 1, 64>}, {pipeline_mode = #tpu.pipeline_mode<synchronous>, transform_indices = @transform_23, window_bounds = array<i64: 64, 128>}, {pipeline_mode = #tpu.pipeline_mode<synchronous>, transform_indices = @transform_24, window_bounds = array<i64: 1, 128>}, {pipeline_mode = #tpu.pipeline_mode<synchronous>, transform_indices = @transform_25, window_bounds = array<i64: 128, 64>}, {pipeline_mode = #tpu.pipeline_mode<synchronous>, transform_indices = @transform_26, window_bounds = array<i64: 1, 64>}, {pipeline_mode = #tpu.pipeline_mode<synchronous>, transform_indices = @transform_27, window_bounds = array<i64: 1, 64>}, {pipeline_mode = #tpu.pipeline_mode<synchronous>, transform_indices = @transform_28, window_bounds = array<i64: 1, 64>}, {transform_indices = @transform_29, window_bounds = array<i64: 1, 8, 64>}]} {
    %0 = tpu.iota {dimensions = array<i32: 1>} : vector<1x8xi32>
    %c5_i32 = arith.constant 5 : i32
    %1 = vector.broadcast %c5_i32 : i32 to vector<1x8xi32>
    %2 = arith.cmpi slt, %0, %1 : vector<1x8xi32>
    %cst = arith.constant 0.000000e+00 : f32
    %cst_0 = arith.constant -1.000000e+30 : f32
    %3 = vector.broadcast %cst : f32 to vector<1x8xf32>
    %4 = vector.broadcast %cst_0 : f32 to vector<1x8xf32>
    %5 = arith.select %2, %3, %4 : vector<1x8xi1>, vector<1x8xf32>
    %c0 = arith.constant 0 : index
    %c0_1 = arith.constant 0 : index
    %c0_2 = arith.constant 0 : index
    %6 = vector.load %arg1[%c0, %c0_1, %c0_2] : memref<1x8x768xf32, #tpu.memory_space<vmem>>, vector<1x8x768xf32>
    %7 = vector.shape_cast %6 : vector<1x8x768xf32> to vector<8x768xf32>
    %8 = arith.truncf %7 : vector<8x768xf32> to vector<8x768xbf16>
    %c0_3 = arith.constant 0 : index
    %c0_4 = arith.constant 0 : index
    %9 = vector.load %arg2[%c0_3, %c0_4] : memref<768x64xbf16, #tpu.memory_space<vmem>>, vector<768x64xbf16>
    %cst_5 = arith.constant dense<0.000000e+00> : vector<8x64xf32>
    %10 = tpu.matmul %8, %9, %cst_5 {dimension_numbers = #tpu.dot_dimension_numbers<[1], [0], [0], [1], [0, 0, 1, 1], [], []>} : vector<8x768xbf16>, vector<768x64xbf16>, vector<8x64xf32> -> vector<8x64xf32>
    %c0_6 = arith.constant 0 : index
    %c0_7 = arith.constant 0 : index
    %11 = vector.load %arg3[%c0_6, %c0_7] : memref<8x64xf32, #tpu.memory_space<vmem>>, vector<8x64xf32>
    %12 = arith.addf %10, %11 : vector<8x64xf32>
    %c0_8 = arith.constant 0 : index
    %c0_9 = arith.constant 0 : index
    %13 = vector.load %arg4[%c0_8, %c0_9] : memref<1x64xf32, #tpu.memory_space<vmem>>, vector<1x64xf32>
    %c0_10 = arith.constant 0 : index
    %c0_11 = arith.constant 0 : index
    %14 = vector.load %arg5[%c0_10, %c0_11] : memref<1x64xf32, #tpu.memory_space<vmem>>, vector<1x64xf32>
    %cst_12 = arith.constant dense<0.000000e+00> : vector<8xf32>
    %15 = vector.multi_reduction <add>, %12, %cst_12 [1] : vector<8x64xf32> to vector<8xf32>
    %16 = vector.shape_cast %15 : vector<8xf32> to vector<8x1xf32>
    %cst_13 = arith.constant 6.400000e+01 : f32
    %17 = vector.broadcast %cst_13 : f32 to vector<8x1xf32>
    %18 = arith.divf %16, %17 : vector<8x1xf32>
    %19 = vector.broadcast %18 : vector<8x1xf32> to vector<8x64xf32>
    %20 = arith.subf %12, %19 : vector<8x64xf32>
    %21 = arith.mulf %20, %20 : vector<8x64xf32>
    %cst_14 = arith.constant dense<0.000000e+00> : vector<8xf32>
    %22 = vector.multi_reduction <add>, %21, %cst_14 [1] : vector<8x64xf32> to vector<8xf32>
    %23 = vector.shape_cast %22 : vector<8xf32> to vector<8x1xf32>
    %cst_15 = arith.constant 6.400000e+01 : f32
    %24 = vector.broadcast %cst_15 : f32 to vector<8x1xf32>
    %25 = arith.divf %23, %24 : vector<8x1xf32>
    %26 = vector.broadcast %18 : vector<8x1xf32> to vector<8x64xf32>
    %27 = arith.subf %12, %26 : vector<8x64xf32>
    %cst_16 = arith.constant 9.99999997E-7 : f32
    %28 = vector.broadcast %cst_16 : f32 to vector<8x1xf32>
    %29 = arith.addf %25, %28 : vector<8x1xf32>
    %30 = math.rsqrt %29 : vector<8x1xf32>
    %31 = vector.broadcast %30 : vector<8x1xf32> to vector<8x64xf32>
    %32 = arith.mulf %27, %31 : vector<8x64xf32>
    %33 = vector.broadcast %13 : vector<1x64xf32> to vector<8x64xf32>
    %34 = arith.mulf %32, %33 : vector<8x64xf32>
    %35 = vector.broadcast %14 : vector<1x64xf32> to vector<8x64xf32>
    %36 = arith.addf %34, %35 : vector<8x64xf32>
    %37 = arith.truncf %36 : vector<8x64xf32> to vector<8x64xbf16>
    %c0_17 = arith.constant 0 : index
    %c0_18 = arith.constant 0 : index
    %38 = vector.load %arg6[%c0_17, %c0_18] : memref<64x192xbf16, #tpu.memory_space<vmem>>, vector<64x192xbf16>
    %cst_19 = arith.constant dense<0.000000e+00> : vector<8x192xf32>
    %39 = tpu.matmul %37, %38, %cst_19 {dimension_numbers = #tpu.dot_dimension_numbers<[1], [0], [0], [1], [0, 0, 1, 1], [], []>} : vector<8x64xbf16>, vector<64x192xbf16>, vector<8x192xf32> -> vector<8x192xf32>
    %c0_20 = arith.constant 0 : index
    %c0_21 = arith.constant 0 : index
    %40 = vector.load %arg7[%c0_20, %c0_21] : memref<1x192xf32, #tpu.memory_space<vmem>>, vector<1x192xf32>
    %41 = vector.broadcast %40 : vector<1x192xf32> to vector<8x192xf32>
    %42 = arith.addf %39, %41 : vector<8x192xf32>
    %43 = vector.extract_strided_slice %42 {offsets = [0, 0], sizes = [8, 16], strides = [1, 1]} : vector<8x192xf32> to vector<8x16xf32>
    %44 = arith.truncf %43 : vector<8x16xf32> to vector<8x16xbf16>
    %45 = vector.extract_strided_slice %42 {offsets = [0, 64], sizes = [8, 16], strides = [1, 1]} : vector<8x192xf32> to vector<8x16xf32>
    %46 = arith.truncf %45 : vector<8x16xf32> to vector<8x16xbf16>
    %47 = vector.extract_strided_slice %42 {offsets = [0, 128], sizes = [8, 16], strides = [1, 1]} : vector<8x192xf32> to vector<8x16xf32>
    %48 = arith.truncf %47 : vector<8x16xf32> to vector<8x16xbf16>
    %cst_22 = arith.constant dense<0.000000e+00> : vector<8x8xf32>
    %49 = tpu.matmul %44, %46, %cst_22 {dimension_numbers = #tpu.dot_dimension_numbers<[1], [1], [0], [0], [0, 0, 1, 0], [], []>} : vector<8x16xbf16>, vector<8x16xbf16>, vector<8x8xf32> -> vector<8x8xf32>
    %cst_23 = arith.constant 2.500000e-01 : f32
    %50 = vector.broadcast %cst_23 : f32 to vector<8x8xf32>
    %51 = arith.mulf %49, %50 : vector<8x8xf32>
    %52 = vector.broadcast %5 : vector<1x8xf32> to vector<8x8xf32>
    %53 = arith.addf %51, %52 : vector<8x8xf32>
    %cst_24 = arith.constant dense<0xFF800000> : vector<8xf32>
    %54 = vector.multi_reduction <maximumf>, %53, %cst_24 [1] : vector<8x8xf32> to vector<8xf32>
    %55 = vector.shape_cast %54 : vector<8xf32> to vector<8x1xf32>
    %56 = vector.broadcast %55 : vector<8x1xf32> to vector<8x8xf32>
    %57 = arith.subf %53, %56 : vector<8x8xf32>
    %58 = math.exp %57 : vector<8x8xf32>
    %cst_25 = arith.constant dense<0.000000e+00> : vector<8xf32>
    %59 = vector.multi_reduction <add>, %58, %cst_25 [1] : vector<8x8xf32> to vector<8xf32>
    %60 = vector.shape_cast %59 : vector<8xf32> to vector<8x1xf32>
    %61 = vector.broadcast %60 : vector<8x1xf32> to vector<8x8xf32>
    %62 = arith.divf %58, %61 : vector<8x8xf32>
    %63 = arith.truncf %62 : vector<8x8xf32> to vector<8x8xbf16>
    %cst_26 = arith.constant dense<0.000000e+00> : vector<8x16xf32>
    %64 = tpu.matmul %63, %48, %cst_26 {dimension_numbers = #tpu.dot_dimension_numbers<[1], [0], [0], [1], [0, 0, 1, 1], [], []>} : vector<8x8xbf16>, vector<8x16xbf16>, vector<8x16xf32> -> vector<8x16xf32>
    %c0_27 = arith.constant 0 : index
    %c0_28 = arith.constant 0 : index
    %65 = vector.load %arg31[%c0_27, %c0_28] : memref<8x64xf32, #tpu.memory_space<vmem>>, vector<8x16xf32>
    tpu.vector_store %arg31[%c0_27, %c0_28], %64 {strides = array<i32>} : memref<8x64xf32, #tpu.memory_space<vmem>>, vector<8x16xf32>,
    %66 = vector.extract_strided_slice %42 {offsets = [0, 16], sizes = [8, 16], strides = [1, 1]} : vector<8x192xf32> to vector<8x16xf32>
    %67 = arith.truncf %66 : vector<8x16xf32> to vector<8x16xbf16>
    %68 = vector.extract_strided_slice %42 {offsets = [0, 80], sizes = [8, 16], strides = [1, 1]} : vector<8x192xf32> to vector<8x16xf32>
    %69 = arith.truncf %68 : vector<8x16xf32> to vector<8x16xbf16>
    %70 = vector.extract_strided_slice %42 {offsets = [0, 144], sizes = [8, 16], strides = [1, 1]} : vector<8x192xf32> to vector<8x16xf32>
    %71 = arith.truncf %70 : vector<8x16xf32> to vector<8x16xbf16>
    %cst_29 = arith.constant dense<0.000000e+00> : vector<8x8xf32>
    %72 = tpu.matmul %67, %69, %cst_29 {dimension_numbers = #tpu.dot_dimension_numbers<[1], [1], [0], [0], [0, 0, 1, 0], [], []>} : vector<8x16xbf16>, vector<8x16xbf16>, vector<8x8xf32> -> vector<8x8xf32>
    %cst_30 = arith.constant 2.500000e-01 : f32
    %73 = vector.broadcast %cst_30 : f32 to vector<8x8xf32>
    %74 = arith.mulf %72, %73 : vector<8x8xf32>
    %75 = vector.broadcast %5 : vector<1x8xf32> to vector<8x8xf32>
    %76 = arith.addf %74, %75 : vector<8x8xf32>
    %cst_31 = arith.constant dense<0xFF800000> : vector<8xf32>
    %77 = vector.multi_reduction <maximumf>, %76, %cst_31 [1] : vector<8x8xf32> to vector<8xf32>
    %78 = vector.shape_cast %77 : vector<8xf32> to vector<8x1xf32>
    %79 = vector.broadcast %78 : vector<8x1xf32> to vector<8x8xf32>
    %80 = arith.subf %76, %79 : vector<8x8xf32>
    %81 = math.exp %80 : vector<8x8xf32>
    %cst_32 = arith.constant dense<0.000000e+00> : vector<8xf32>
    %82 = vector.multi_reduction <add>, %81, %cst_32 [1] : vector<8x8xf32> to vector<8xf32>
    %83 = vector.shape_cast %82 : vector<8xf32> to vector<8x1xf32>
    %84 = vector.broadcast %83 : vector<8x1xf32> to vector<8x8xf32>
    %85 = arith.divf %81, %84 : vector<8x8xf32>
    %86 = arith.truncf %85 : vector<8x8xf32> to vector<8x8xbf16>
    %cst_33 = arith.constant dense<0.000000e+00> : vector<8x16xf32>
    %87 = tpu.matmul %86, %71, %cst_33 {dimension_numbers = #tpu.dot_dimension_numbers<[1], [0], [0], [1], [0, 0, 1, 1], [], []>} : vector<8x8xbf16>, vector<8x16xbf16>, vector<8x16xf32> -> vector<8x16xf32>
    %c0_34 = arith.constant 0 : index
    %c16 = arith.constant 16 : index
    %88 = vector.load %arg31[%c0_34, %c16] : memref<8x64xf32, #tpu.memory_space<vmem>>, vector<8x16xf32>
    tpu.vector_store %arg31[%c0_34, %c16], %87 {strides = array<i32>} : memref<8x64xf32, #tpu.memory_space<vmem>>, vector<8x16xf32>,
    %89 = vector.extract_strided_slice %42 {offsets = [0, 32], sizes = [8, 16], strides = [1, 1]} : vector<8x192xf32> to vector<8x16xf32>
    %90 = arith.truncf %89 : vector<8x16xf32> to vector<8x16xbf16>
    %91 = vector.extract_strided_slice %42 {offsets = [0, 96], sizes = [8, 16], strides = [1, 1]} : vector<8x192xf32> to vector<8x16xf32>
    %92 = arith.truncf %91 : vector<8x16xf32> to vector<8x16xbf16>
    %93 = vector.extract_strided_slice %42 {offsets = [0, 160], sizes = [8, 16], strides = [1, 1]} : vector<8x192xf32> to vector<8x16xf32>
    %94 = arith.truncf %93 : vector<8x16xf32> to vector<8x16xbf16>
    %cst_35 = arith.constant dense<0.000000e+00> : vector<8x8xf32>
    %95 = tpu.matmul %90, %92, %cst_35 {dimension_numbers = #tpu.dot_dimension_numbers<[1], [1], [0], [0], [0, 0, 1, 0], [], []>} : vector<8x16xbf16>, vector<8x16xbf16>, vector<8x8xf32> -> vector<8x8xf32>
    %cst_36 = arith.constant 2.500000e-01 : f32
    %96 = vector.broadcast %cst_36 : f32 to vector<8x8xf32>
    %97 = arith.mulf %95, %96 : vector<8x8xf32>
    %98 = vector.broadcast %5 : vector<1x8xf32> to vector<8x8xf32>
    %99 = arith.addf %97, %98 : vector<8x8xf32>
    %cst_37 = arith.constant dense<0xFF800000> : vector<8xf32>
    %100 = vector.multi_reduction <maximumf>, %99, %cst_37 [1] : vector<8x8xf32> to vector<8xf32>
    %101 = vector.shape_cast %100 : vector<8xf32> to vector<8x1xf32>
    %102 = vector.broadcast %101 : vector<8x1xf32> to vector<8x8xf32>
    %103 = arith.subf %99, %102 : vector<8x8xf32>
    %104 = math.exp %103 : vector<8x8xf32>
    %cst_38 = arith.constant dense<0.000000e+00> : vector<8xf32>
    %105 = vector.multi_reduction <add>, %104, %cst_38 [1] : vector<8x8xf32> to vector<8xf32>
    %106 = vector.shape_cast %105 : vector<8xf32> to vector<8x1xf32>
    %107 = vector.broadcast %106 : vector<8x1xf32> to vector<8x8xf32>
    %108 = arith.divf %104, %107 : vector<8x8xf32>
    %109 = arith.truncf %108 : vector<8x8xf32> to vector<8x8xbf16>
    %cst_39 = arith.constant dense<0.000000e+00> : vector<8x16xf32>
    %110 = tpu.matmul %109, %94, %cst_39 {dimension_numbers = #tpu.dot_dimension_numbers<[1], [0], [0], [1], [0, 0, 1, 1], [], []>} : vector<8x8xbf16>, vector<8x16xbf16>, vector<8x16xf32> -> vector<8x16xf32>
    %c0_40 = arith.constant 0 : index
    %c32 = arith.constant 32 : index
    %111 = vector.load %arg31[%c0_40, %c32] : memref<8x64xf32, #tpu.memory_space<vmem>>, vector<8x16xf32>
    tpu.vector_store %arg31[%c0_40, %c32], %110 {strides = array<i32>} : memref<8x64xf32, #tpu.memory_space<vmem>>, vector<8x16xf32>,
    %112 = vector.extract_strided_slice %42 {offsets = [0, 48], sizes = [8, 16], strides = [1, 1]} : vector<8x192xf32> to vector<8x16xf32>
    %113 = arith.truncf %112 : vector<8x16xf32> to vector<8x16xbf16>
    %114 = vector.extract_strided_slice %42 {offsets = [0, 112], sizes = [8, 16], strides = [1, 1]} : vector<8x192xf32> to vector<8x16xf32>
    %115 = arith.truncf %114 : vector<8x16xf32> to vector<8x16xbf16>
    %116 = vector.extract_strided_slice %42 {offsets = [0, 176], sizes = [8, 16], strides = [1, 1]} : vector<8x192xf32> to vector<8x16xf32>
    %117 = arith.truncf %116 : vector<8x16xf32> to vector<8x16xbf16>
    %cst_41 = arith.constant dense<0.000000e+00> : vector<8x8xf32>
    %118 = tpu.matmul %113, %115, %cst_41 {dimension_numbers = #tpu.dot_dimension_numbers<[1], [1], [0], [0], [0, 0, 1, 0], [], []>} : vector<8x16xbf16>, vector<8x16xbf16>, vector<8x8xf32> -> vector<8x8xf32>
    %cst_42 = arith.constant 2.500000e-01 : f32
    %119 = vector.broadcast %cst_42 : f32 to vector<8x8xf32>
    %120 = arith.mulf %118, %119 : vector<8x8xf32>
    %121 = vector.broadcast %5 : vector<1x8xf32> to vector<8x8xf32>
    %122 = arith.addf %120, %121 : vector<8x8xf32>
    %cst_43 = arith.constant dense<0xFF800000> : vector<8xf32>
    %123 = vector.multi_reduction <maximumf>, %122, %cst_43 [1] : vector<8x8xf32> to vector<8xf32>
    %124 = vector.shape_cast %123 : vector<8xf32> to vector<8x1xf32>
    %125 = vector.broadcast %124 : vector<8x1xf32> to vector<8x8xf32>
    %126 = arith.subf %122, %125 : vector<8x8xf32>
    %127 = math.exp %126 : vector<8x8xf32>
    %cst_44 = arith.constant dense<0.000000e+00> : vector<8xf32>
    %128 = vector.multi_reduction <add>, %127, %cst_44 [1] : vector<8x8xf32> to vector<8xf32>
    %129 = vector.shape_cast %128 : vector<8xf32> to vector<8x1xf32>
    %130 = vector.broadcast %129 : vector<8x1xf32> to vector<8x8xf32>
    %131 = arith.divf %127, %130 : vector<8x8xf32>
    %132 = arith.truncf %131 : vector<8x8xf32> to vector<8x8xbf16>
    %cst_45 = arith.constant dense<0.000000e+00> : vector<8x16xf32>
    %133 = tpu.matmul %132, %117, %cst_45 {dimension_numbers = #tpu.dot_dimension_numbers<[1], [0], [0], [1], [0, 0, 1, 1], [], []>} : vector<8x8xbf16>, vector<8x16xbf16>, vector<8x16xf32> -> vector<8x16xf32>
    %c0_46 = arith.constant 0 : index
    %c48 = arith.constant 48 : index
    %134 = vector.load %arg31[%c0_46, %c48] : memref<8x64xf32, #tpu.memory_space<vmem>>, vector<8x16xf32>
    tpu.vector_store %arg31[%c0_46, %c48], %133 {strides = array<i32>} : memref<8x64xf32, #tpu.memory_space<vmem>>, vector<8x16xf32>,
    %c0_47 = arith.constant 0 : index
    %c0_48 = arith.constant 0 : index
    %135 = vector.load %arg31[%c0_47, %c0_48] : memref<8x64xf32, #tpu.memory_space<vmem>>, vector<8x64xf32>
    %136 = arith.truncf %135 : vector<8x64xf32> to vector<8x64xbf16>
    %c0_49 = arith.constant 0 : index
    %c0_50 = arith.constant 0 : index
    %137 = vector.load %arg8[%c0_49, %c0_50] : memref<64x64xbf16, #tpu.memory_space<vmem>>, vector<64x64xbf16>
    %cst_51 = arith.constant dense<0.000000e+00> : vector<8x64xf32>
    %138 = tpu.matmul %136, %137, %cst_51 {dimension_numbers = #tpu.dot_dimension_numbers<[1], [0], [0], [1], [0, 0, 1, 1], [], []>} : vector<8x64xbf16>, vector<64x64xbf16>, vector<8x64xf32> -> vector<8x64xf32>
    %c0_52 = arith.constant 0 : index
    %c0_53 = arith.constant 0 : index
    %139 = vector.load %arg9[%c0_52, %c0_53] : memref<1x64xf32, #tpu.memory_space<vmem>>, vector<1x64xf32>
    %140 = vector.broadcast %139 : vector<1x64xf32> to vector<8x64xf32>
    %141 = arith.addf %138, %140 : vector<8x64xf32>
    %142 = arith.addf %12, %141 : vector<8x64xf32>
    %c0_54 = arith.constant 0 : index
    %c0_55 = arith.constant 0 : index
    %143 = vector.load %arg10[%c0_54, %c0_55] : memref<1x64xf32, #tpu.memory_space<vmem>>, vector<1x64xf32>
    %c0_56 = arith.constant 0 : index
    %c0_57 = arith.constant 0 : index
    %144 = vector.load %arg11[%c0_56, %c0_57] : memref<1x64xf32, #tpu.memory_space<vmem>>, vector<1x64xf32>
    %cst_58 = arith.constant dense<0.000000e+00> : vector<8xf32>
    %145 = vector.multi_reduction <add>, %142, %cst_58 [1] : vector<8x64xf32> to vector<8xf32>
    %146 = vector.shape_cast %145 : vector<8xf32> to vector<8x1xf32>
    %cst_59 = arith.constant 6.400000e+01 : f32
    %147 = vector.broadcast %cst_59 : f32 to vector<8x1xf32>
    %148 = arith.divf %146, %147 : vector<8x1xf32>
    %149 = vector.broadcast %148 : vector<8x1xf32> to vector<8x64xf32>
    %150 = arith.subf %142, %149 : vector<8x64xf32>
    %151 = arith.mulf %150, %150 : vector<8x64xf32>
    %cst_60 = arith.constant dense<0.000000e+00> : vector<8xf32>
    %152 = vector.multi_reduction <add>, %151, %cst_60 [1] : vector<8x64xf32> to vector<8xf32>
    %153 = vector.shape_cast %152 : vector<8xf32> to vector<8x1xf32>
    %cst_61 = arith.constant 6.400000e+01 : f32
    %154 = vector.broadcast %cst_61 : f32 to vector<8x1xf32>
    %155 = arith.divf %153, %154 : vector<8x1xf32>
    %156 = vector.broadcast %148 : vector<8x1xf32> to vector<8x64xf32>
    %157 = arith.subf %142, %156 : vector<8x64xf32>
    %cst_62 = arith.constant 9.99999997E-7 : f32
    %158 = vector.broadcast %cst_62 : f32 to vector<8x1xf32>
    %159 = arith.addf %155, %158 : vector<8x1xf32>
    %160 = math.rsqrt %159 : vector<8x1xf32>
    %161 = vector.broadcast %160 : vector<8x1xf32> to vector<8x64xf32>
    %162 = arith.mulf %157, %161 : vector<8x64xf32>
    %163 = vector.broadcast %143 : vector<1x64xf32> to vector<8x64xf32>
    %164 = arith.mulf %162, %163 : vector<8x64xf32>
    %165 = vector.broadcast %144 : vector<1x64xf32> to vector<8x64xf32>
    %166 = arith.addf %164, %165 : vector<8x64xf32>
    %167 = arith.truncf %166 : vector<8x64xf32> to vector<8x64xbf16>
    %c0_63 = arith.constant 0 : index
    %c0_64 = arith.constant 0 : index
    %168 = vector.load %arg12[%c0_63, %c0_64] : memref<64x128xbf16, #tpu.memory_space<vmem>>, vector<64x128xbf16>
    %cst_65 = arith.constant dense<0.000000e+00> : vector<8x128xf32>
    %169 = tpu.matmul %167, %168, %cst_65 {dimension_numbers = #tpu.dot_dimension_numbers<[1], [0], [0], [1], [0, 0, 1, 1], [], []>} : vector<8x64xbf16>, vector<64x128xbf16>, vector<8x128xf32> -> vector<8x128xf32>
    %c0_66 = arith.constant 0 : index
    %c0_67 = arith.constant 0 : index
    %170 = vector.load %arg13[%c0_66, %c0_67] : memref<1x128xf32, #tpu.memory_space<vmem>>, vector<1x128xf32>
    %171 = vector.broadcast %170 : vector<1x128xf32> to vector<8x128xf32>
    %172 = arith.addf %169, %171 : vector<8x128xf32>
    %cst_68 = arith.constant 5.000000e-01 : f32
    %173 = vector.broadcast %cst_68 : f32 to vector<8x128xf32>
    %174 = arith.mulf %173, %172 : vector<8x128xf32>
    %cst_69 = arith.constant 0.707106769 : f32
    %175 = vector.broadcast %cst_69 : f32 to vector<8x128xf32>
    %176 = arith.mulf %172, %175 : vector<8x128xf32>
    %177 = math.erf %176 : vector<8x128xf32>
    %cst_70 = arith.constant 1.000000e+00 : f32
    %178 = vector.broadcast %cst_70 : f32 to vector<8x128xf32>
    %179 = arith.addf %178, %177 : vector<8x128xf32>
    %180 = arith.mulf %174, %179 : vector<8x128xf32>
    %181 = arith.truncf %180 : vector<8x128xf32> to vector<8x128xbf16>
    %c0_71 = arith.constant 0 : index
    %c0_72 = arith.constant 0 : index
    %182 = vector.load %arg14[%c0_71, %c0_72] : memref<128x64xbf16, #tpu.memory_space<vmem>>, vector<128x64xbf16>
    %cst_73 = arith.constant dense<0.000000e+00> : vector<8x64xf32>
    %183 = tpu.matmul %181, %182, %cst_73 {dimension_numbers = #tpu.dot_dimension_numbers<[1], [0], [0], [1], [0, 0, 1, 1], [], []>} : vector<8x128xbf16>, vector<128x64xbf16>, vector<8x64xf32> -> vector<8x64xf32>
    %c0_74 = arith.constant 0 : index
    %c0_75 = arith.constant 0 : index
    %184 = vector.load %arg15[%c0_74, %c0_75] : memref<1x64xf32, #tpu.memory_space<vmem>>, vector<1x64xf32>
    %185 = vector.broadcast %184 : vector<1x64xf32> to vector<8x64xf32>
    %186 = arith.addf %183, %185 : vector<8x64xf32>
    %187 = arith.addf %142, %186 : vector<8x64xf32>
    %c0_76 = arith.constant 0 : index
    %c0_77 = arith.constant 0 : index
    %188 = vector.load %arg16[%c0_76, %c0_77] : memref<1x64xf32, #tpu.memory_space<vmem>>, vector<1x64xf32>
    %c0_78 = arith.constant 0 : index
    %c0_79 = arith.constant 0 : index
    %189 = vector.load %arg17[%c0_78, %c0_79] : memref<1x64xf32, #tpu.memory_space<vmem>>, vector<1x64xf32>
    %cst_80 = arith.constant dense<0.000000e+00> : vector<8xf32>
    %190 = vector.multi_reduction <add>, %187, %cst_80 [1] : vector<8x64xf32> to vector<8xf32>
    %191 = vector.shape_cast %190 : vector<8xf32> to vector<8x1xf32>
    %cst_81 = arith.constant 6.400000e+01 : f32
    %192 = vector.broadcast %cst_81 : f32 to vector<8x1xf32>
    %193 = arith.divf %191, %192 : vector<8x1xf32>
    %194 = vector.broadcast %193 : vector<8x1xf32> to vector<8x64xf32>
    %195 = arith.subf %187, %194 : vector<8x64xf32>
    %196 = arith.mulf %195, %195 : vector<8x64xf32>
    %cst_82 = arith.constant dense<0.000000e+00> : vector<8xf32>
    %197 = vector.multi_reduction <add>, %196, %cst_82 [1] : vector<8x64xf32> to vector<8xf32>
    %198 = vector.shape_cast %197 : vector<8xf32> to vector<8x1xf32>
    %cst_83 = arith.constant 6.400000e+01 : f32
    %199 = vector.broadcast %cst_83 : f32 to vector<8x1xf32>
    %200 = arith.divf %198, %199 : vector<8x1xf32>
    %201 = vector.broadcast %193 : vector<8x1xf32> to vector<8x64xf32>
    %202 = arith.subf %187, %201 : vector<8x64xf32>
    %cst_84 = arith.constant 9.99999997E-7 : f32
    %203 = vector.broadcast %cst_84 : f32 to vector<8x1xf32>
    %204 = arith.addf %200, %203 : vector<8x1xf32>
    %205 = math.rsqrt %204 : vector<8x1xf32>
    %206 = vector.broadcast %205 : vector<8x1xf32> to vector<8x64xf32>
    %207 = arith.mulf %202, %206 : vector<8x64xf32>
    %208 = vector.broadcast %188 : vector<1x64xf32> to vector<8x64xf32>
    %209 = arith.mulf %207, %208 : vector<8x64xf32>
    %210 = vector.broadcast %189 : vector<1x64xf32> to vector<8x64xf32>
    %211 = arith.addf %209, %210 : vector<8x64xf32>
    %212 = arith.truncf %211 : vector<8x64xf32> to vector<8x64xbf16>
    %c0_85 = arith.constant 0 : index
    %c0_86 = arith.constant 0 : index
    %213 = vector.load %arg18[%c0_85, %c0_86] : memref<64x192xbf16, #tpu.memory_space<vmem>>, vector<64x192xbf16>
    %cst_87 = arith.constant dense<0.000000e+00> : vector<8x192xf32>
    %214 = tpu.matmul %212, %213, %cst_87 {dimension_numbers = #tpu.dot_dimension_numbers<[1], [0], [0], [1], [0, 0, 1, 1], [], []>} : vector<8x64xbf16>, vector<64x192xbf16>, vector<8x192xf32> -> vector<8x192xf32>
    %c0_88 = arith.constant 0 : index
    %c0_89 = arith.constant 0 : index
    %215 = vector.load %arg19[%c0_88, %c0_89] : memref<1x192xf32, #tpu.memory_space<vmem>>, vector<1x192xf32>
    %216 = vector.broadcast %215 : vector<1x192xf32> to vector<8x192xf32>
    %217 = arith.addf %214, %216 : vector<8x192xf32>
    %218 = vector.extract_strided_slice %217 {offsets = [0, 0], sizes = [8, 16], strides = [1, 1]} : vector<8x192xf32> to vector<8x16xf32>
    %219 = arith.truncf %218 : vector<8x16xf32> to vector<8x16xbf16>
    %220 = vector.extract_strided_slice %217 {offsets = [0, 64], sizes = [8, 16], strides = [1, 1]} : vector<8x192xf32> to vector<8x16xf32>
    %221 = arith.truncf %220 : vector<8x16xf32> to vector<8x16xbf16>
    %222 = vector.extract_strided_slice %217 {offsets = [0, 128], sizes = [8, 16], strides = [1, 1]} : vector<8x192xf32> to vector<8x16xf32>
    %223 = arith.truncf %222 : vector<8x16xf32> to vector<8x16xbf16>
    %cst_90 = arith.constant dense<0.000000e+00> : vector<8x8xf32>
    %224 = tpu.matmul %219, %221, %cst_90 {dimension_numbers = #tpu.dot_dimension_numbers<[1], [1], [0], [0], [0, 0, 1, 0], [], []>} : vector<8x16xbf16>, vector<8x16xbf16>, vector<8x8xf32> -> vector<8x8xf32>
    %cst_91 = arith.constant 2.500000e-01 : f32
    %225 = vector.broadcast %cst_91 : f32 to vector<8x8xf32>
    %226 = arith.mulf %224, %225 : vector<8x8xf32>
    %227 = vector.broadcast %5 : vector<1x8xf32> to vector<8x8xf32>
    %228 = arith.addf %226, %227 : vector<8x8xf32>
    %cst_92 = arith.constant dense<0xFF800000> : vector<8xf32>
    %229 = vector.multi_reduction <maximumf>, %228, %cst_92 [1] : vector<8x8xf32> to vector<8xf32>
    %230 = vector.shape_cast %229 : vector<8xf32> to vector<8x1xf32>
    %231 = vector.broadcast %230 : vector<8x1xf32> to vector<8x8xf32>
    %232 = arith.subf %228, %231 : vector<8x8xf32>
    %233 = math.exp %232 : vector<8x8xf32>
    %cst_93 = arith.constant dense<0.000000e+00> : vector<8xf32>
    %234 = vector.multi_reduction <add>, %233, %cst_93 [1] : vector<8x8xf32> to vector<8xf32>
    %235 = vector.shape_cast %234 : vector<8xf32> to vector<8x1xf32>
    %236 = vector.broadcast %235 : vector<8x1xf32> to vector<8x8xf32>
    %237 = arith.divf %233, %236 : vector<8x8xf32>
    %238 = arith.truncf %237 : vector<8x8xf32> to vector<8x8xbf16>
    %cst_94 = arith.constant dense<0.000000e+00> : vector<8x16xf32>
    %239 = tpu.matmul %238, %223, %cst_94 {dimension_numbers = #tpu.dot_dimension_numbers<[1], [0], [0], [1], [0, 0, 1, 1], [], []>} : vector<8x8xbf16>, vector<8x16xbf16>, vector<8x16xf32> -> vector<8x16xf32>
    %c0_95 = arith.constant 0 : index
    %c0_96 = arith.constant 0 : index
    %240 = vector.load %arg31[%c0_95, %c0_96] : memref<8x64xf32, #tpu.memory_space<vmem>>, vector<8x16xf32>
    tpu.vector_store %arg31[%c0_95, %c0_96], %239 {strides = array<i32>} : memref<8x64xf32, #tpu.memory_space<vmem>>, vector<8x16xf32>,
    %241 = vector.extract_strided_slice %217 {offsets = [0, 16], sizes = [8, 16], strides = [1, 1]} : vector<8x192xf32> to vector<8x16xf32>
    %242 = arith.truncf %241 : vector<8x16xf32> to vector<8x16xbf16>
    %243 = vector.extract_strided_slice %217 {offsets = [0, 80], sizes = [8, 16], strides = [1, 1]} : vector<8x192xf32> to vector<8x16xf32>
    %244 = arith.truncf %243 : vector<8x16xf32> to vector<8x16xbf16>
    %245 = vector.extract_strided_slice %217 {offsets = [0, 144], sizes = [8, 16], strides = [1, 1]} : vector<8x192xf32> to vector<8x16xf32>
    %246 = arith.truncf %245 : vector<8x16xf32> to vector<8x16xbf16>
    %cst_97 = arith.constant dense<0.000000e+00> : vector<8x8xf32>
    %247 = tpu.matmul %242, %244, %cst_97 {dimension_numbers = #tpu.dot_dimension_numbers<[1], [1], [0], [0], [0, 0, 1, 0], [], []>} : vector<8x16xbf16>, vector<8x16xbf16>, vector<8x8xf32> -> vector<8x8xf32>
    %cst_98 = arith.constant 2.500000e-01 : f32
    %248 = vector.broadcast %cst_98 : f32 to vector<8x8xf32>
    %249 = arith.mulf %247, %248 : vector<8x8xf32>
    %250 = vector.broadcast %5 : vector<1x8xf32> to vector<8x8xf32>
    %251 = arith.addf %249, %250 : vector<8x8xf32>
    %cst_99 = arith.constant dense<0xFF800000> : vector<8xf32>
    %252 = vector.multi_reduction <maximumf>, %251, %cst_99 [1] : vector<8x8xf32> to vector<8xf32>
    %253 = vector.shape_cast %252 : vector<8xf32> to vector<8x1xf32>
    %254 = vector.broadcast %253 : vector<8x1xf32> to vector<8x8xf32>
    %255 = arith.subf %251, %254 : vector<8x8xf32>
    %256 = math.exp %255 : vector<8x8xf32>
    %cst_100 = arith.constant dense<0.000000e+00> : vector<8xf32>
    %257 = vector.multi_reduction <add>, %256, %cst_100 [1] : vector<8x8xf32> to vector<8xf32>
    %258 = vector.shape_cast %257 : vector<8xf32> to vector<8x1xf32>
    %259 = vector.broadcast %258 : vector<8x1xf32> to vector<8x8xf32>
    %260 = arith.divf %256, %259 : vector<8x8xf32>
    %261 = arith.truncf %260 : vector<8x8xf32> to vector<8x8xbf16>
    %cst_101 = arith.constant dense<0.000000e+00> : vector<8x16xf32>
    %262 = tpu.matmul %261, %246, %cst_101 {dimension_numbers = #tpu.dot_dimension_numbers<[1], [0], [0], [1], [0, 0, 1, 1], [], []>} : vector<8x8xbf16>, vector<8x16xbf16>, vector<8x16xf32> -> vector<8x16xf32>
    %c0_102 = arith.constant 0 : index
    %c16_103 = arith.constant 16 : index
    %263 = vector.load %arg31[%c0_102, %c16_103] : memref<8x64xf32, #tpu.memory_space<vmem>>, vector<8x16xf32>
    tpu.vector_store %arg31[%c0_102, %c16_103], %262 {strides = array<i32>} : memref<8x64xf32, #tpu.memory_space<vmem>>, vector<8x16xf32>,
    %264 = vector.extract_strided_slice %217 {offsets = [0, 32], sizes = [8, 16], strides = [1, 1]} : vector<8x192xf32> to vector<8x16xf32>
    %265 = arith.truncf %264 : vector<8x16xf32> to vector<8x16xbf16>
    %266 = vector.extract_strided_slice %217 {offsets = [0, 96], sizes = [8, 16], strides = [1, 1]} : vector<8x192xf32> to vector<8x16xf32>
    %267 = arith.truncf %266 : vector<8x16xf32> to vector<8x16xbf16>
    %268 = vector.extract_strided_slice %217 {offsets = [0, 160], sizes = [8, 16], strides = [1, 1]} : vector<8x192xf32> to vector<8x16xf32>
    %269 = arith.truncf %268 : vector<8x16xf32> to vector<8x16xbf16>
    %cst_104 = arith.constant dense<0.000000e+00> : vector<8x8xf32>
    %270 = tpu.matmul %265, %267, %cst_104 {dimension_numbers = #tpu.dot_dimension_numbers<[1], [1], [0], [0], [0, 0, 1, 0], [], []>} : vector<8x16xbf16>, vector<8x16xbf16>, vector<8x8xf32> -> vector<8x8xf32>
    %cst_105 = arith.constant 2.500000e-01 : f32
    %271 = vector.broadcast %cst_105 : f32 to vector<8x8xf32>
    %272 = arith.mulf %270, %271 : vector<8x8xf32>
    %273 = vector.broadcast %5 : vector<1x8xf32> to vector<8x8xf32>
    %274 = arith.addf %272, %273 : vector<8x8xf32>
    %cst_106 = arith.constant dense<0xFF800000> : vector<8xf32>
    %275 = vector.multi_reduction <maximumf>, %274, %cst_106 [1] : vector<8x8xf32> to vector<8xf32>
    %276 = vector.shape_cast %275 : vector<8xf32> to vector<8x1xf32>
    %277 = vector.broadcast %276 : vector<8x1xf32> to vector<8x8xf32>
    %278 = arith.subf %274, %277 : vector<8x8xf32>
    %279 = math.exp %278 : vector<8x8xf32>
    %cst_107 = arith.constant dense<0.000000e+00> : vector<8xf32>
    %280 = vector.multi_reduction <add>, %279, %cst_107 [1] : vector<8x8xf32> to vector<8xf32>
    %281 = vector.shape_cast %280 : vector<8xf32> to vector<8x1xf32>
    %282 = vector.broadcast %281 : vector<8x1xf32> to vector<8x8xf32>
    %283 = arith.divf %279, %282 : vector<8x8xf32>
    %284 = arith.truncf %283 : vector<8x8xf32> to vector<8x8xbf16>
    %cst_108 = arith.constant dense<0.000000e+00> : vector<8x16xf32>
    %285 = tpu.matmul %284, %269, %cst_108 {dimension_numbers = #tpu.dot_dimension_numbers<[1], [0], [0], [1], [0, 0, 1, 1], [], []>} : vector<8x8xbf16>, vector<8x16xbf16>, vector<8x16xf32> -> vector<8x16xf32>
    %c0_109 = arith.constant 0 : index
    %c32_110 = arith.constant 32 : index
    %286 = vector.load %arg31[%c0_109, %c32_110] : memref<8x64xf32, #tpu.memory_space<vmem>>, vector<8x16xf32>
    tpu.vector_store %arg31[%c0_109, %c32_110], %285 {strides = array<i32>} : memref<8x64xf32, #tpu.memory_space<vmem>>, vector<8x16xf32>,
    %287 = vector.extract_strided_slice %217 {offsets = [0, 48], sizes = [8, 16], strides = [1, 1]} : vector<8x192xf32> to vector<8x16xf32>
    %288 = arith.truncf %287 : vector<8x16xf32> to vector<8x16xbf16>
    %289 = vector.extract_strided_slice %217 {offsets = [0, 112], sizes = [8, 16], strides = [1, 1]} : vector<8x192xf32> to vector<8x16xf32>
    %290 = arith.truncf %289 : vector<8x16xf32> to vector<8x16xbf16>
    %291 = vector.extract_strided_slice %217 {offsets = [0, 176], sizes = [8, 16], strides = [1, 1]} : vector<8x192xf32> to vector<8x16xf32>
    %292 = arith.truncf %291 : vector<8x16xf32> to vector<8x16xbf16>
    %cst_111 = arith.constant dense<0.000000e+00> : vector<8x8xf32>
    %293 = tpu.matmul %288, %290, %cst_111 {dimension_numbers = #tpu.dot_dimension_numbers<[1], [1], [0], [0], [0, 0, 1, 0], [], []>} : vector<8x16xbf16>, vector<8x16xbf16>, vector<8x8xf32> -> vector<8x8xf32>
    %cst_112 = arith.constant 2.500000e-01 : f32
    %294 = vector.broadcast %cst_112 : f32 to vector<8x8xf32>
    %295 = arith.mulf %293, %294 : vector<8x8xf32>
    %296 = vector.broadcast %5 : vector<1x8xf32> to vector<8x8xf32>
    %297 = arith.addf %295, %296 : vector<8x8xf32>
    %cst_113 = arith.constant dense<0xFF800000> : vector<8xf32>
    %298 = vector.multi_reduction <maximumf>, %297, %cst_113 [1] : vector<8x8xf32> to vector<8xf32>
    %299 = vector.shape_cast %298 : vector<8xf32> to vector<8x1xf32>
    %300 = vector.broadcast %299 : vector<8x1xf32> to vector<8x8xf32>
    %301 = arith.subf %297, %300 : vector<8x8xf32>
    %302 = math.exp %301 : vector<8x8xf32>
    %cst_114 = arith.constant dense<0.000000e+00> : vector<8xf32>
    %303 = vector.multi_reduction <add>, %302, %cst_114 [1] : vector<8x8xf32> to vector<8xf32>
    %304 = vector.shape_cast %303 : vector<8xf32> to vector<8x1xf32>
    %305 = vector.broadcast %304 : vector<8x1xf32> to vector<8x8xf32>
    %306 = arith.divf %302, %305 : vector<8x8xf32>
    %307 = arith.truncf %306 : vector<8x8xf32> to vector<8x8xbf16>
    %cst_115 = arith.constant dense<0.000000e+00> : vector<8x16xf32>
    %308 = tpu.matmul %307, %292, %cst_115 {dimension_numbers = #tpu.dot_dimension_numbers<[1], [0], [0], [1], [0, 0, 1, 1], [], []>} : vector<8x8xbf16>, vector<8x16xbf16>, vector<8x16xf32> -> vector<8x16xf32>
    %c0_116 = arith.constant 0 : index
    %c48_117 = arith.constant 48 : index
    %309 = vector.load %arg31[%c0_116, %c48_117] : memref<8x64xf32, #tpu.memory_space<vmem>>, vector<8x16xf32>
    tpu.vector_store %arg31[%c0_116, %c48_117], %308 {strides = array<i32>} : memref<8x64xf32, #tpu.memory_space<vmem>>, vector<8x16xf32>,
    %c0_118 = arith.constant 0 : index
    %c0_119 = arith.constant 0 : index
    %310 = vector.load %arg31[%c0_118, %c0_119] : memref<8x64xf32, #tpu.memory_space<vmem>>, vector<8x64xf32>
    %311 = arith.truncf %310 : vector<8x64xf32> to vector<8x64xbf16>
    %c0_120 = arith.constant 0 : index
    %c0_121 = arith.constant 0 : index
    %312 = vector.load %arg20[%c0_120, %c0_121] : memref<64x64xbf16, #tpu.memory_space<vmem>>, vector<64x64xbf16>
    %cst_122 = arith.constant dense<0.000000e+00> : vector<8x64xf32>
    %313 = tpu.matmul %311, %312, %cst_122 {dimension_numbers = #tpu.dot_dimension_numbers<[1], [0], [0], [1], [0, 0, 1, 1], [], []>} : vector<8x64xbf16>, vector<64x64xbf16>, vector<8x64xf32> -> vector<8x64xf32>
    %c0_123 = arith.constant 0 : index
    %c0_124 = arith.constant 0 : index
    %314 = vector.load %arg21[%c0_123, %c0_124] : memref<1x64xf32, #tpu.memory_space<vmem>>, vector<1x64xf32>
    %315 = vector.broadcast %314 : vector<1x64xf32> to vector<8x64xf32>
    %316 = arith.addf %313, %315 : vector<8x64xf32>
    %317 = arith.addf %187, %316 : vector<8x64xf32>
    %c0_125 = arith.constant 0 : index
    %c0_126 = arith.constant 0 : index
    %318 = vector.load %arg22[%c0_125, %c0_126] : memref<1x64xf32, #tpu.memory_space<vmem>>, vector<1x64xf32>
    %c0_127 = arith.constant 0 : index
    %c0_128 = arith.constant 0 : index
    %319 = vector.load %arg23[%c0_127, %c0_128] : memref<1x64xf32, #tpu.memory_space<vmem>>, vector<1x64xf32>
    %cst_129 = arith.constant dense<0.000000e+00> : vector<8xf32>
    %320 = vector.multi_reduction <add>, %317, %cst_129 [1] : vector<8x64xf32> to vector<8xf32>
    %321 = vector.shape_cast %320 : vector<8xf32> to vector<8x1xf32>
    %cst_130 = arith.constant 6.400000e+01 : f32
    %322 = vector.broadcast %cst_130 : f32 to vector<8x1xf32>
    %323 = arith.divf %321, %322 : vector<8x1xf32>
    %324 = vector.broadcast %323 : vector<8x1xf32> to vector<8x64xf32>
    %325 = arith.subf %317, %324 : vector<8x64xf32>
    %326 = arith.mulf %325, %325 : vector<8x64xf32>
    %cst_131 = arith.constant dense<0.000000e+00> : vector<8xf32>
    %327 = vector.multi_reduction <add>, %326, %cst_131 [1] : vector<8x64xf32> to vector<8xf32>
    %328 = vector.shape_cast %327 : vector<8xf32> to vector<8x1xf32>
    %cst_132 = arith.constant 6.400000e+01 : f32
    %329 = vector.broadcast %cst_132 : f32 to vector<8x1xf32>
    %330 = arith.divf %328, %329 : vector<8x1xf32>
    %331 = vector.broadcast %323 : vector<8x1xf32> to vector<8x64xf32>
    %332 = arith.subf %317, %331 : vector<8x64xf32>
    %cst_133 = arith.constant 9.99999997E-7 : f32
    %333 = vector.broadcast %cst_133 : f32 to vector<8x1xf32>
    %334 = arith.addf %330, %333 : vector<8x1xf32>
    %335 = math.rsqrt %334 : vector<8x1xf32>
    %336 = vector.broadcast %335 : vector<8x1xf32> to vector<8x64xf32>
    %337 = arith.mulf %332, %336 : vector<8x64xf32>
    %338 = vector.broadcast %318 : vector<1x64xf32> to vector<8x64xf32>
    %339 = arith.mulf %337, %338 : vector<8x64xf32>
    %340 = vector.broadcast %319 : vector<1x64xf32> to vector<8x64xf32>
    %341 = arith.addf %339, %340 : vector<8x64xf32>
    %342 = arith.truncf %341 : vector<8x64xf32> to vector<8x64xbf16>
    %c0_134 = arith.constant 0 : index
    %c0_135 = arith.constant 0 : index
    %343 = vector.load %arg24[%c0_134, %c0_135] : memref<64x128xbf16, #tpu.memory_space<vmem>>, vector<64x128xbf16>
    %cst_136 = arith.constant dense<0.000000e+00> : vector<8x128xf32>
    %344 = tpu.matmul %342, %343, %cst_136 {dimension_numbers = #tpu.dot_dimension_numbers<[1], [0], [0], [1], [0, 0, 1, 1], [], []>} : vector<8x64xbf16>, vector<64x128xbf16>, vector<8x128xf32> -> vector<8x128xf32>
    %c0_137 = arith.constant 0 : index
    %c0_138 = arith.constant 0 : index
    %345 = vector.load %arg25[%c0_137, %c0_138] : memref<1x128xf32, #tpu.memory_space<vmem>>, vector<1x128xf32>
    %346 = vector.broadcast %345 : vector<1x128xf32> to vector<8x128xf32>
    %347 = arith.addf %344, %346 : vector<8x128xf32>
    %cst_139 = arith.constant 5.000000e-01 : f32
    %348 = vector.broadcast %cst_139 : f32 to vector<8x128xf32>
    %349 = arith.mulf %348, %347 : vector<8x128xf32>
    %cst_140 = arith.constant 0.707106769 : f32
    %350 = vector.broadcast %cst_140 : f32 to vector<8x128xf32>
    %351 = arith.mulf %347, %350 : vector<8x128xf32>
    %352 = math.erf %351 : vector<8x128xf32>
    %cst_141 = arith.constant 1.000000e+00 : f32
    %353 = vector.broadcast %cst_141 : f32 to vector<8x128xf32>
    %354 = arith.addf %353, %352 : vector<8x128xf32>
    %355 = arith.mulf %349, %354 : vector<8x128xf32>
    %356 = arith.truncf %355 : vector<8x128xf32> to vector<8x128xbf16>
    %c0_142 = arith.constant 0 : index
    %c0_143 = arith.constant 0 : index
    %357 = vector.load %arg26[%c0_142, %c0_143] : memref<128x64xbf16, #tpu.memory_space<vmem>>, vector<128x64xbf16>
    %cst_144 = arith.constant dense<0.000000e+00> : vector<8x64xf32>
    %358 = tpu.matmul %356, %357, %cst_144 {dimension_numbers = #tpu.dot_dimension_numbers<[1], [0], [0], [1], [0, 0, 1, 1], [], []>} : vector<8x128xbf16>, vector<128x64xbf16>, vector<8x64xf32> -> vector<8x64xf32>
    %c0_145 = arith.constant 0 : index
    %c0_146 = arith.constant 0 : index
    %359 = vector.load %arg27[%c0_145, %c0_146] : memref<1x64xf32, #tpu.memory_space<vmem>>, vector<1x64xf32>
    %360 = vector.broadcast %359 : vector<1x64xf32> to vector<8x64xf32>
    %361 = arith.addf %358, %360 : vector<8x64xf32>
    %362 = arith.addf %317, %361 : vector<8x64xf32>
    %c0_147 = arith.constant 0 : index
    %c0_148 = arith.constant 0 : index
    %363 = vector.load %arg28[%c0_147, %c0_148] : memref<1x64xf32, #tpu.memory_space<vmem>>, vector<1x64xf32>
    %c0_149 = arith.constant 0 : index
    %c0_150 = arith.constant 0 : index
    %364 = vector.load %arg29[%c0_149, %c0_150] : memref<1x64xf32, #tpu.memory_space<vmem>>, vector<1x64xf32>
    %cst_151 = arith.constant dense<0.000000e+00> : vector<8xf32>
    %365 = vector.multi_reduction <add>, %362, %cst_151 [1] : vector<8x64xf32> to vector<8xf32>
    %366 = vector.shape_cast %365 : vector<8xf32> to vector<8x1xf32>
    %cst_152 = arith.constant 6.400000e+01 : f32
    %367 = vector.broadcast %cst_152 : f32 to vector<8x1xf32>
    %368 = arith.divf %366, %367 : vector<8x1xf32>
    %369 = vector.broadcast %368 : vector<8x1xf32> to vector<8x64xf32>
    %370 = arith.subf %362, %369 : vector<8x64xf32>
    %371 = arith.mulf %370, %370 : vector<8x64xf32>
    %cst_153 = arith.constant dense<0.000000e+00> : vector<8xf32>
    %372 = vector.multi_reduction <add>, %371, %cst_153 [1] : vector<8x64xf32> to vector<8xf32>
    %373 = vector.shape_cast %372 : vector<8xf32> to vector<8x1xf32>
    %cst_154 = arith.constant 6.400000e+01 : f32
    %374 = vector.broadcast %cst_154 : f32 to vector<8x1xf32>
    %375 = arith.divf %373, %374 : vector<8x1xf32>
    %376 = vector.broadcast %368 : vector<8x1xf32> to vector<8x64xf32>
    %377 = arith.subf %362, %376 : vector<8x64xf32>
    %cst_155 = arith.constant 9.99999997E-7 : f32
    %378 = vector.broadcast %cst_155 : f32 to vector<8x1xf32>
    %379 = arith.addf %375, %378 : vector<8x1xf32>
    %380 = math.rsqrt %379 : vector<8x1xf32>
    %381 = vector.broadcast %380 : vector<8x1xf32> to vector<8x64xf32>
    %382 = arith.mulf %377, %381 : vector<8x64xf32>
    %383 = vector.broadcast %363 : vector<1x64xf32> to vector<8x64xf32>
    %384 = arith.mulf %382, %383 : vector<8x64xf32>
    %385 = vector.broadcast %364 : vector<1x64xf32> to vector<8x64xf32>
    %386 = arith.addf %384, %385 : vector<8x64xf32>
    %c0_156 = arith.constant 0 : index
    %c0_157 = arith.constant 0 : index
    %c0_158 = arith.constant 0 : index
    %387 = vector.load %arg30[%c0_156, %c0_157, %c0_158] : memref<1x8x64xf32, #tpu.memory_space<vmem>>, vector<1x8x64xf32>
    %388 = vector.shape_cast %387 : vector<1x8x64xf32> to vector<8x64xf32>
    %389 = vector.shape_cast %386 : vector<8x64xf32> to vector<1x8x64xf32>
    tpu.vector_store %arg30[%c0_156, %c0_157, %c0_158], %389 {strides = array<i32>} : memref<1x8x64xf32, #tpu.memory_space<vmem>>, vector<1x8x64xf32>,
    return
  }
  func.func @transform_0(%arg0: i32) -> (i32, i32, i32) {
    %c0_i32 = arith.constant 0 : i32
    %c0_i32_0 = arith.constant 0 : i32
    %c0_i32_1 = arith.constant 0 : i32
    return %arg0, %c0_i32, %c0_i32_0 : i32, i32, i32
  }
  func.func @transform_1(%arg0: i32) -> (i32, i32) {
    %c0_i32 = arith.constant 0 : i32
    %c0_i32_0 = arith.constant 0 : i32
    %c0_i32_1 = arith.constant 0 : i32
    return %c0_i32, %c0_i32_0 : i32, i32
  }
  func.func @transform_2(%arg0: i32) -> (i32, i32) {
    %c0_i32 = arith.constant 0 : i32
    %c0_i32_0 = arith.constant 0 : i32
    %c0_i32_1 = arith.constant 0 : i32
    return %c0_i32, %c0_i32_0 : i32, i32
  }
  func.func @transform_3(%arg0: i32) -> (i32, i32) {
    %c0_i32 = arith.constant 0 : i32
    %c0_i32_0 = arith.constant 0 : i32
    %c0_i32_1 = arith.constant 0 : i32
    return %c0_i32, %c0_i32_0 : i32, i32
  }
  func.func @transform_4(%arg0: i32) -> (i32, i32) {
    %c0_i32 = arith.constant 0 : i32
    %c0_i32_0 = arith.constant 0 : i32
    %c0_i32_1 = arith.constant 0 : i32
    return %c0_i32, %c0_i32_0 : i32, i32
  }
  func.func @transform_5(%arg0: i32) -> (i32, i32) {
    %c0_i32 = arith.constant 0 : i32
    %c0_i32_0 = arith.constant 0 : i32
    %c0_i32_1 = arith.constant 0 : i32
    return %c0_i32, %c0_i32_0 : i32, i32
  }
  func.func @transform_6(%arg0: i32) -> (i32, i32) {
    %c0_i32 = arith.constant 0 : i32
    %c0_i32_0 = arith.constant 0 : i32
    %c0_i32_1 = arith.constant 0 : i32
    return %c0_i32, %c0_i32_0 : i32, i32
  }
  func.func @transform_7(%arg0: i32) -> (i32, i32) {
    %c0_i32 = arith.constant 0 : i32
    %c0_i32_0 = arith.constant 0 : i32
    %c0_i32_1 = arith.constant 0 : i32
    return %c0_i32, %c0_i32_0 : i32, i32
  }
  func.func @transform_8(%arg0: i32) -> (i32, i32) {
    %c0_i32 = arith.constant 0 : i32
    %c0_i32_0 = arith.constant 0 : i32
    %c0_i32_1 = arith.constant 0 : i32
    return %c0_i32, %c0_i32_0 : i32, i32
  }
  func.func @transform_9(%arg0: i32) -> (i32, i32) {
    %c0_i32 = arith.constant 0 : i32
    %c0_i32_0 = arith.constant 0 : i32
    %c0_i32_1 = arith.constant 0 : i32
    return %c0_i32, %c0_i32_0 : i32, i32
  }
  func.func @transform_10(%arg0: i32) -> (i32, i32) {
    %c0_i32 = arith.constant 0 : i32
    %c0_i32_0 = arith.constant 0 : i32
    %c0_i32_1 = arith.constant 0 : i32
    return %c0_i32, %c0_i32_0 : i32, i32
  }
  func.func @transform_11(%arg0: i32) -> (i32, i32) {
    %c0_i32 = arith.constant 0 : i32
    %c0_i32_0 = arith.constant 0 : i32
    %c0_i32_1 = arith.constant 0 : i32
    return %c0_i32, %c0_i32_0 : i32, i32
  }
  func.func @transform_12(%arg0: i32) -> (i32, i32) {
    %c0_i32 = arith.constant 0 : i32
    %c0_i32_0 = arith.constant 0 : i32
    %c0_i32_1 = arith.constant 0 : i32
    return %c0_i32, %c0_i32_0 : i32, i32
  }
  func.func @transform_13(%arg0: i32) -> (i32, i32) {
    %c0_i32 = arith.constant 0 : i32
    %c0_i32_0 = arith.constant 0 : i32
    %c0_i32_1 = arith.constant 0 : i32
    return %c0_i32, %c0_i32_0 : i32, i32
  }
  func.func @transform_14(%arg0: i32) -> (i32, i32) {
    %c0_i32 = arith.constant 0 : i32
    %c0_i32_0 = arith.constant 0 : i32
    %c0_i32_1 = arith.constant 0 : i32
    return %c0_i32, %c0_i32_0 : i32, i32
  }
  func.func @transform_15(%arg0: i32) -> (i32, i32) {
    %c0_i32 = arith.constant 0 : i32
    %c0_i32_0 = arith.constant 0 : i32
    %c0_i32_1 = arith.constant 0 : i32
    return %c0_i32, %c0_i32_0 : i32, i32
  }
  func.func @transform_16(%arg0: i32) -> (i32, i32) {
    %c0_i32 = arith.constant 0 : i32
    %c0_i32_0 = arith.constant 0 : i32
    %c0_i32_1 = arith.constant 0 : i32
    return %c0_i32, %c0_i32_0 : i32, i32
  }
  func.func @transform_17(%arg0: i32) -> (i32, i32) {
    %c0_i32 = arith.constant 0 : i32
    %c0_i32_0 = arith.constant 0 : i32
    %c0_i32_1 = arith.constant 0 : i32
    return %c0_i32, %c0_i32_0 : i32, i32
  }
  func.func @transform_18(%arg0: i32) -> (i32, i32) {
    %c0_i32 = arith.constant 0 : i32
    %c0_i32_0 = arith.constant 0 : i32
    %c0_i32_1 = arith.constant 0 : i32
    return %c0_i32, %c0_i32_0 : i32, i32
  }
  func.func @transform_19(%arg0: i32) -> (i32, i32) {
    %c0_i32 = arith.constant 0 : i32
    %c0_i32_0 = arith.constant 0 : i32
    %c0_i32_1 = arith.constant 0 : i32
    return %c0_i32, %c0_i32_0 : i32, i32
  }
  func.func @transform_20(%arg0: i32) -> (i32, i32) {
    %c0_i32 = arith.constant 0 : i32
    %c0_i32_0 = arith.constant 0 : i32
    %c0_i32_1 = arith.constant 0 : i32
    return %c0_i32, %c0_i32_0 : i32, i32
  }
  func.func @transform_21(%arg0: i32) -> (i32, i32) {
    %c0_i32 = arith.constant 0 : i32
    %c0_i32_0 = arith.constant 0 : i32
    %c0_i32_1 = arith.constant 0 : i32
    return %c0_i32, %c0_i32_0 : i32, i32
  }
  func.func @transform_22(%arg0: i32) -> (i32, i32) {
    %c0_i32 = arith.constant 0 : i32
    %c0_i32_0 = arith.constant 0 : i32
    %c0_i32_1 = arith.constant 0 : i32
    return %c0_i32, %c0_i32_0 : i32, i32
  }
  func.func @transform_23(%arg0: i32) -> (i32, i32) {
    %c0_i32 = arith.constant 0 : i32
    %c0_i32_0 = arith.constant 0 : i32
    %c0_i32_1 = arith.constant 0 : i32
    return %c0_i32, %c0_i32_0 : i32, i32
  }
  func.func @transform_24(%arg0: i32) -> (i32, i32) {
    %c0_i32 = arith.constant 0 : i32
    %c0_i32_0 = arith.constant 0 : i32
    %c0_i32_1 = arith.constant 0 : i32
    return %c0_i32, %c0_i32_0 : i32, i32
  }
  func.func @transform_25(%arg0: i32) -> (i32, i32) {
    %c0_i32 = arith.constant 0 : i32
    %c0_i32_0 = arith.constant 0 : i32
    %c0_i32_1 = arith.constant 0 : i32
    return %c0_i32, %c0_i32_0 : i32, i32
  }
  func.func @transform_26(%arg0: i32) -> (i32, i32) {
    %c0_i32 = arith.constant 0 : i32
    %c0_i32_0 = arith.constant 0 : i32
    %c0_i32_1 = arith.constant 0 : i32
    return %c0_i32, %c0_i32_0 : i32, i32
  }
  func.func @transform_27(%arg0: i32) -> (i32, i32) {
    %c0_i32 = arith.constant 0 : i32
    %c0_i32_0 = arith.constant 0 : i32
    %c0_i32_1 = arith.constant 0 : i32
    return %c0_i32, %c0_i32_0 : i32, i32
  }
  func.func @transform_28(%arg0: i32) -> (i32, i32) {
    %c0_i32 = arith.constant 0 : i32
    %c0_i32_0 = arith.constant 0 : i32
    %c0_i32_1 = arith.constant 0 : i32
    return %c0_i32, %c0_i32_0 : i32, i32
  }
  func.func @transform_29(%arg0: i32) -> (i32, i32, i32) {
    %c0_i32 = arith.constant 0 : i32
    %c0_i32_0 = arith.constant 0 : i32
    %c0_i32_1 = arith.constant 0 : i32
    return %arg0, %c0_i32, %c0_i32_0 : i32, i32, i32
  }
}

</mosaic_0001>

<bundles_post_ra>
// kernel: vit_encoder_forward.1
= control target key start
LH: loop header
LB: loop body
LE: loop exit
PB: predicated region body
PF: predicated region fallthrough
CT: control target
= control target key end

     0   :  { %s4039_s6 = smov 1   ;;  %s4040_s10 = smov 2   ;;  %s4627_s0 = inlined_call_operand.smem [shape: u32[30], index: -1, kind: input, shape index: {}] }
   0x1   :  { %s4087_s5 = sld [smem:[%s4627_s0]]   ;;  %s4041_s14 = smov 3  }
   0x2   :  { %s4092_s9 = sld [smem:[%s4627_s0 + %s4039_s6]]   ;;  %s4042_s18 = smov 4  }
   0x3   :  { %s4097_s13 = sld [smem:[%s4627_s0 + %s4040_s10]]   ;;  %s4043_s22 = smov 5  }
   0x4   :  { %s4102_s17 = sld [smem:[%s4627_s0 + %s4041_s14]]   ;;  %s4044_s26 = smov 6  }
   0x5   :  { %s4107_s21 = sld [smem:[%s4627_s0 + %s4042_s18]]   ;;  %s4045_s30 = smov 7  }
   0x6   :  { %s4112_s25 = sld [smem:[%s4627_s0 + %s4043_s22]]   ;;  %s4046_s4 = smov 8  }
   0x7   :  { %s4117_s29 = sld [smem:[%s4627_s0 + %s4044_s26]]   ;;  %s4047_s10 = smov 9  }
   0x8   :  { %s4122_s3 = sld [smem:[%s4627_s0 + %s4045_s30]]   ;;  %s4048_s15 = smov 10  }
   0x9   :  { %s4127_s8 = sld [smem:[%s4627_s0 + %s4046_s4]]   ;;  %s4049_s20 = smov 11  }
   0xa   :  { %s4132_s14 = sld [smem:[%s4627_s0 + %s4047_s10]]   ;;  %s4050_s26 = smov 12  }
   0xb   :  { %s4137_s19 = sld [smem:[%s4627_s0 + %s4048_s15]]   ;;  %s4051_s1 = smov 13  }
   0xc   :  { %s4142_s24 = sld [smem:[%s4627_s0 + %s4049_s20]]   ;;  %s4052_s7 = smov 14  }
   0xd   :  { %s4147_s30 = sld [smem:[%s4627_s0 + %s4050_s26]]   ;;  %s4053_s15 = smov 15  }
   0xe   :  { %s4152_s6 = sld [smem:[%s4627_s0 + %s4051_s1]]   ;;  %s4054_s22 = smov 16  }
   0xf   :  { %s4157_s12 = sld [smem:[%s4627_s0 + %s4052_s7]]   ;;  %s4055_s28 = smov 17  }
  0x10   :  { %s4162_s20 = sld [smem:[%s4627_s0 + %s4053_s15]]   ;;  %s4056_s7 = smov 18  }
  0x11   :  { %s4167_s27 = sld [smem:[%s4627_s0 + %s4054_s22]]   ;;  %s4057_s15 = smov 19  }
  0x12   :  { %s4172_s4 = sld [smem:[%s4627_s0 + %s4055_s28]]   ;;  %s4058_s22 = smov 20  }
  0x13   :  { %s4059_s28 = smov 21  }
  0x15   :  { %4632 = sst [smem:[#allocation3_spill]] %s4157_s12 }
  0x16   :  { %4633 = sst [smem:[#allocation4_spill]] %s4162_s20 }
  0x17   :  { %4634 = sst [smem:[#allocation5_spill]] %s4167_s27 }
  0x18   :  { %4635 = sst [smem:[#allocation6_spill]] %s4172_s4 }
  0x19   :  { %s4177_s12 = sld [smem:[%s4627_s0 + %s4056_s7]]   ;;  %s4060_s7 = smov 22  }
  0x1a   :  { %s4182_s20 = sld [smem:[%s4627_s0 + %s4057_s15]]   ;;  %s4061_s15 = smov 23  }
  0x1b   :  { %s4187_s27 = sld [smem:[%s4627_s0 + %s4058_s22]]   ;;  %s4062_s22 = smov 24  }
  0x1c   :  { %s4192_s4 = sld [smem:[%s4627_s0 + %s4059_s28]]   ;;  %s4063_s28 = smov 25  }
  0x1f   :  { %4636 = sst [smem:[#allocation7_spill]] %s4177_s12 }
  0x20   :  { %4637 = sst [smem:[#allocation8_spill]] %s4182_s20 }
  0x21   :  { %4638 = sst [smem:[#allocation9_spill]] %s4187_s27 }
  0x22   :  { %4639 = sst [smem:[#allocation10_spill]] %s4192_s4 }
  0x23   :  { %s4197_s12 = sld [smem:[%s4627_s0 + %s4060_s7]]   ;;  %s4064_s7 = smov 26  }
  0x24   :  { %s4202_s20 = sld [smem:[%s4627_s0 + %s4061_s15]]   ;;  %s4065_s15 = smov 27  }
  0x25   :  { %s4207_s27 = sld [smem:[%s4627_s0 + %s4062_s22]]   ;;  %s4066_s22 = smov 28  }
  0x26   :  { %s4212_s4 = sld [smem:[%s4627_s0 + %s4063_s28]]   ;;  %s4067_s28 = smov 29  }
  0x29   :  { %4640 = sst [smem:[#allocation11_spill]] %s4197_s12 }
  0x2a   :  { %4641 = sst [smem:[#allocation12_spill]] %s4202_s20 }
  0x2b   :  { %4642 = sst [smem:[#allocation13_spill]] %s4207_s27 }
  0x2c   :  { %4643 = sst [smem:[#allocation14_spill]] %s4212_s4 }
  0x2d   :  { %s4217_s12 = sld [smem:[%s4627_s0 + %s4064_s7]]   ;;  %s4234_s7 = smov 0  }
  0x2e   :  { %s4222_s20 = sld [smem:[%s4627_s0 + %s4065_s15]]  }
  0x2f   :  { %s4227_s27 = sld [smem:[%s4627_s0 + %s4066_s22]]  }
  0x30   :  { %s4232_s4 = sld [smem:[%s4627_s0 + %s4067_s28]]  }
  0x31 LB: > { %s3369_s10 = sadd.s32 4294967295, %s4037_s7   ;;  %p3373_p0 = scmp.ge.s32.totalorder %s4037_s7, 1  ;;  %s4037_s7 = sphi %s4234_s7, %s69_s7  }
  0x32   : > { %p817_p1 = scmp.lt.s32.totalorder %s4037_s7, 3 }
  0x34   : > { %p818_p2 = pnand %p3373_p0, %p817_p1 }
  0x35   : > { %v3881_v0 = vld [vmem:[%s4092_s9 + $0x40] sm:$0xff] (!%p818_p2)   ;;  %v3885_v4 = vld [vmem:[%s4092_s9 + $0x48] sm:$0xff] (!%p818_p2)   ;;  %v3889_v8 = vld [vmem:[%s4092_s9 + $0x50] sm:$0xff] (!%p818_p2)   ;;  %p892_p3 = scmp.lt.s32.totalorder (!%p818_p2), %s3369_s10, 1  ;;  %vm1425_vm0 = vcmask (!%p818_p2), 523264   ;;  %vm4070_vm1 = vmmov (!%p818_p2), 0  }
  0x36   : > { %821 = sbr.rel (%p818_p2) target bundleno = 5769 (0x1689), region = 136  ;;  %v3882_v1 = vld [vmem:[%s4092_s9] sm:$0xff] (!%p818_p2)   ;;  %3512 = vmatprep.subr.bf16.mxu0 (!%p818_p2), %v3881_v0  ;;  %v3886_v5 = vld [vmem:[%s4092_s9 + $0x8] sm:$0xff] (!%p818_p2)   ;;  %v3890_v9 = vld [vmem:[%s4092_s9 + $0x10] sm:$0xff] (!%p818_p2)   ;;  %s4071_s15 = smov (!%p818_p2), 112   ;;  %vm1564_vm2 = vcmask (!%p818_p2), 130048  }
  0x37   : > { %v3883_v2 = vld [vmem:[%s4092_s9 + $0xc0] sm:$0xff] (!%p818_p2)   ;;  %3513 = vmatpush3.bf16.msra.mxu0 (!%p818_p2), %v3882_v1  ;;  %v3887_v6 = vld [vmem:[%s4092_s9 + $0xc8] sm:$0xff] (!%p818_p2)   ;;  %v3891_v10 = vld [vmem:[%s4092_s9 + $0xd0] sm:$0xff] (!%p818_p2)   ;;  %s4072_s16 = smov (!%p818_p2), 64   ;;  %s4073_s18 = smov (!%p818_p2), 48   ;;  %vm1629_vm3 = vcmask (!%p818_p2), 1043456  }
  0x38   : > { %v3884_v3 = vld [vmem:[%s4092_s9 + $0x80] sm:$0xff] (!%p818_p2)   ;;  %3534 = vmatprep.subr.bf16.mxu1 (!%p818_p2), %v3883_v2  ;;  %3514 = vmatprep.subr.bf16.mxu0 (!%p818_p2), %v3885_v4  ;;  %v3888_v7 = vld [vmem:[%s4092_s9 + $0x88] sm:$0xff] (!%p818_p2)   ;;  %v3892_v11 = vld [vmem:[%s4092_s9 + $0x90] sm:$0xff] (!%p818_p2)   ;;  %s4074_s22 = smov (!%p818_p2), 32   ;;  %s4075_s23 = smov (!%p818_p2), 96   ;;  %vm1613_vm5 = vcmask (!%p818_p2), 64512  }
  0x39   : > { %3535 = vmatpush3.bf16.msra.mxu1 (!%p818_p2), %v3884_v3  ;;  %v3893_v12 = vld [vmem:[%s4092_s9 + $0x58] sm:$0xff] (!%p818_p2)   ;;  %v3897_v16 = vld [vmem:[%s4092_s9 + $0x60] sm:$0xff] (!%p818_p2)   ;;  %v3901_v20 = vld [vmem:[%s4092_s9 + $0x68] sm:$0xff] (!%p818_p2)   ;;  %s4076_s26 = smov (!%p818_p2), 16   ;;  %s4077_s28 = smov (!%p818_p2), 80   ;;  %vm1791_vm6 = vcmask (!%p818_p2), 261248  }
  0x3a   : > { %3536 = vmatprep.subr.bf16.mxu1 (!%p818_p2), %v3887_v6  ;;  %v3894_v13 = vld [vmem:[%s4092_s9 + $0x18] sm:$0xff] (!%p818_p2)   ;;  %v3898_v17 = vld [vmem:[%s4092_s9 + $0x20] sm:$0xff] (!%p818_p2)   ;;  %v3902_v21 = vld [vmem:[%s4092_s9 + $0x28] sm:$0xff] (!%p818_p2)   ;;  %vm1909_vm7 = vcmask (!%p818_p2), 392448   ;;  %vm2027_vm8 = vcmask (!%p818_p2), 523648   ;;  %s4644_s1 = sld [smem:[#allocation3_spill]] (!%p818_p2) }
  0x3b   : > { %3515 = vmatpush3.bf16.msra.mxu0 (!%p818_p2), %v3886_v5  ;;  %v3895_v14 = vld [vmem:[%s4092_s9 + $0xd8] sm:$0xff] (!%p818_p2)   ;;  %v3899_v18 = vld [vmem:[%s4092_s9 + $0xe0] sm:$0xff] (!%p818_p2)   ;;  %v3903_v22 = vld [vmem:[%s4092_s9 + $0xe8] sm:$0xff] (!%p818_p2)   ;;  %s4645_s2 = sld [smem:[#allocation6_spill]] (!%p818_p2) }
  0x3c   : > { %3516 = vmatprep.subr.bf16.mxu0 (!%p818_p2), %v3889_v8  ;;  %v3896_v15 = vld [vmem:[%s4092_s9 + $0x98] sm:$0xff] (!%p818_p2)   ;;  %v3900_v19 = vld [vmem:[%s4092_s9 + $0xa0] sm:$0xff] (!%p818_p2)   ;;  %v3904_v23 = vld [vmem:[%s4092_s9 + $0xa8] sm:$0xff] (!%p818_p2)  }
  0x3d   : > { %3537 = vmatpush3.bf16.msra.mxu1 %v3888_v7  ;;  %s4657_s10 = smov (!%p892_p3, %s3369_s10), 1  ;;  %v3905_v24 = vld [vmem:[%s4092_s9 + $0x70] sm:$0xff]   ;;  %v3909_v28 = vld [vmem:[%s4092_s9 + $0x78] sm:$0xff]   ;;  %v3913_v36 = vld [vmem:[%s4092_s9 + $0x140] sm:$0xff]  }
  0x3e   : > { %3538 = vmatprep.subr.bf16.mxu1 %v3891_v10  ;;  %s3832_s0 = smul.u32 48, %s4657_s10  ;;  %v3906_v25 = vld [vmem:[%s4092_s9 + $0x30] sm:$0xff]   ;;  %v3910_v29 = vld [vmem:[%s4092_s9 + $0x38] sm:$0xff]   ;;  %v3914_v39 = vld [vmem:[%s4092_s9 + $0x100] sm:$0xff]  }
  0x3f   : > { %3517 = vmatpush3.bf16.msra.mxu0 %v3890_v9  ;;  %v3907_v26 = vld [vmem:[%s4092_s9 + $0xf0] sm:$0xff]   ;;  %v3911_v30 = vld [vmem:[%s4092_s9 + $0xf8] sm:$0xff]   ;;  %v3915_v42 = vld [vmem:[%s4092_s9 + $0x148] sm:$0xff]  }
  0x40   : > { %3518 = vmatprep.subr.bf16.mxu0 %v3893_v12  ;;  %v3908_v27 = vld [vmem:[%s4092_s9 + $0xb0] sm:$0xff]   ;;  %s4279_s11 = scalar_lea.vmem %s4087_s5, %s3832_s0  ;;  %v3912_v33 = vld [vmem:[%s4092_s9 + $0xb8] sm:$0xff]   ;;  %v3916_v43 = vld [vmem:[%s4092_s9 + $0x108] sm:$0xff]   ;;  %s4646_s0 = sld [smem:[#allocation4_spill]] }
  0x41   : > { %3539 = vmatpush3.bf16.msra.mxu1 %v3892_v11  ;;  %v907_v31 = vld [vmem:[%s4279_s11 + $0x8] sm:$0xff]  ;;  %v906_v34 = vld [vmem:[%s4279_s11] sm:$0xff]  ;;  %v909_v37 = vld [vmem:[%s4279_s11 + $0x18] sm:$0xff] }
  0x42   : > { %3540 = vmatprep.subr.bf16.mxu1 %v3895_v14  ;;  %v913_v32 = vpack.c.bf16 %v907_v31, %v907_v31  ;;  %v912_v35 = vpack.c.bf16 %v906_v34, %v906_v34  ;;  %v915_v38 = vpack.c.bf16 %v909_v37, %v909_v37  ;;  %v908_v40 = vld [vmem:[%s4279_s11 + $0x10] sm:$0xff]  ;;  %v3919_v46 = vld [vmem:[%s4092_s9 + $0x158] sm:$0xff]   ;;  %v3921_v48 = vld [vmem:[%s4092_s9 + $0x160] sm:$0xff]  }
  0x43   : > { %3519 = vmatpush3.bf16.msra.mxu0 %v3894_v13  ;;  %v914_v41 = vpack.c.bf16 %v908_v40, %v908_v40  ;;  %v3917_v44 = vld [vmem:[%s4092_s9 + $0x150] sm:$0xff]   ;;  %v3920_v47 = vld [vmem:[%s4092_s9 + $0x118] sm:$0xff]   ;;  %v3922_v49 = vld [vmem:[%s4092_s9 + $0x120] sm:$0xff]   ;;  %v902_v40 = vlaneseq }
  0x44   : > { %3520 = vmatprep.subr.bf16.mxu0 %v3897_v16  ;;  %1335 = vmatprep.mubr.bf16.mxu0 %v913_v32  ;;  %v3918_v45 = vld [vmem:[%s4092_s9 + $0x110] sm:$0xff]   ;;  %v3923_v50 = vld [vmem:[%s4092_s9 + $0x168] sm:$0xff]   ;;  %v3927_v56 = vld [vmem:[%s4092_s9 + $0x178] sm:$0xff]  }
  0x45   : > { %3541 = vmatpush3.bf16.msra.mxu1 %v3896_v15  ;;  %1375 = vmatprep.mubr.bf16.mxu1 %v915_v38  ;;  %v911_v51 = vld [vmem:[%s4279_s11 + $0x28] sm:$0xff]  ;;  %v3925_v54 = vld [vmem:[%s4092_s9 + $0x170] sm:$0xff]   ;;  %v3928_v57 = vld [vmem:[%s4092_s9 + $0x138] sm:$0xff]  }
  0x46   : > { %3542 = vmatprep.subr.bf16.mxu1 %v3899_v18  ;;  %v3924_v52 = vld [vmem:[%s4092_s9 + $0x128] sm:$0xff]   ;;  %v917_v53 = vpack.c.bf16 %v911_v51, %v911_v51  ;;  %v3926_v55 = vld [vmem:[%s4092_s9 + $0x130] sm:$0xff]   ;;  %v910_v58 = vld [vmem:[%s4279_s11 + $0x20] sm:$0xff]  ;;  %s4647_s11 = sld [smem:[#allocation5_spill]] }
  0x47   : > { %3521 = vmatpush3.bf16.msra.mxu0 %v3898_v17  ;;  %v916_v59 = vpack.c.bf16 %v910_v58, %v910_v58  ;;  %v1014_v61 = vld [vmem:[%s4097_s13] sm:$0xff] }
  0x48   : > { %3522 = vmatprep.subr.bf16.mxu0 %v3901_v20  ;;  %v3424_v34 = vld [vmem:[%s4102_s17] ss:$0 sm:$0xff] }
  0x49   : > { %3543 = vmatpush3.bf16.msra.mxu1 %v3900_v19 }
  0x4a   : > { %3544 = vmatprep.subr.bf16.mxu1 %v3903_v22  ;;  %v3929_v22 = vld [vmem:[%s4112_s25] ss:$8 sps:$4 sm:$0xff]  }
  0x4b   : > { %3523 = vmatpush3.bf16.msra.mxu0 %v3902_v21  ;;  %v3931_v21 = vld [vmem:[%s4112_s25 + $0x4] ss:$8 sps:$4 sm:$0xff]  }
  0x4c   : > { %3524 = vmatprep.subr.bf16.mxu0 %v3905_v24  ;;  %v3932_v24 = vld [vmem:[%s4112_s25 + $0x10] ss:$8 sps:$4 sm:$0xff]  }
  0x4d   : > { %3545 = vmatpush3.bf16.msra.mxu1 %v3904_v23  ;;  %v3934_v23 = vld [vmem:[%s4112_s25 + $0x14] ss:$8 sps:$4 sm:$0xff]  }
  0x4e   : > { %3546 = vmatprep.subr.bf16.mxu1 %v3907_v26  ;;  %v3935_v26 = vld [vmem:[%s4112_s25 + $0x20] ss:$8 sps:$4 sm:$0xff]  }
  0x4f   : > { %3525 = vmatpush3.bf16.msra.mxu0 %v3906_v25  ;;  %v3937_v25 = vld [vmem:[%s4112_s25 + $0x24] ss:$8 sps:$4 sm:$0xff]  }
  0x50   : > { %3526 = vmatprep.subr.bf16.mxu0 %v3909_v28  ;;  %v3938_v28 = vld [vmem:[%s4112_s25 + $0x30] ss:$8 sps:$4 sm:$0xff]  }
  0x51   : > { %3547 = vmatpush3.bf16.msra.mxu1 %v3908_v27  ;;  %v3940_v27 = vld [vmem:[%s4112_s25 + $0x34] ss:$8 sps:$4 sm:$0xff]  }
  0x52   : > { %3548 = vmatprep.subr.bf16.mxu1 %v3911_v30 }
  0x53   : > { %3527 = vmatpush3.bf16.msra.mxu0 %v3910_v29  ;;  %v4068_v29 = vmov 0  }
  0x54   : > { %3556 = vmatprep.subr.bf16.mxu0 %v3913_v36  ;;  %v3425_v36 = vld [vmem:[%s4107_s21] ss:$0 sm:$0xff] }
  0x55   : > { %3549 = vmatpush3.bf16.msra.mxu1 %v3912_v33 }
  0x56   : > { %1336 = vmatmul.mubr.bf16.vlgmr.msra.gmra.mrb[0].mxu0 %v912_v35  ;;  %1518 = vmatprep.subr.bf16.mxu1 %v3931_v21 }
  0x57   : > { %3557 = vmatpush3.bf16.msra.mxu0 %v3914_v39  ;;  %1415 = vmatprep.mubr.bf16.mxu0 %v917_v53 }
  0x58   : > { %1376 = vmatmul.mubr.bf16.vlgmr.msra.gmra.mrb[0].mxu1 %v914_v41  ;;  %3558 = vmatprep.subr.bf16.mxu0 %v3915_v42  ;;  %v4326_v41 = vshrl.u32 %v902_v40, 7 }
  0x59   : > { %1519 = vmatpush1.bf16.msra.mxu1 %v3929_v22  ;;  %1550 = vmatprep.mubr.bf16.mxu1 %v4068_v29 }
  0x5a   : > { %1520 = vmatprep.subr.bf16.mxu1 %v3934_v23  ;;  %v1467_v42 = vsub.s32 0, %v4326_v41 }
  0x5b   : > { %3559 = vmatpush3.bf16.msra.mxu0 %v3916_v43  ;;  %v4069_v43 = vmov 0.0  }
  0x5c   : > { %3560 = vmatprep.subr.bf16.mxu0 %v3917_v44  ;;  %v1463_v44 = vld [vmem:[%s4117_s29] sm:$0x3] }
  0x5d   : > { %1521 = vmatpush1.bf16.msra.mxu1 %v3932_v24 }
  0x5e   : > { %1522 = vmatprep.subr.bf16.mxu1 %v3937_v25 }
  0x5f   : > { %3561 = vmatpush3.bf16.msra.mxu0 %v3918_v45  ;;  %v1468_v45 = vrot.slane %v1463_v44, %v1467_v42 }
  0x60   : > { %3562 = vmatprep.subr.bf16.mxu0 %v3919_v46 }
  0x61   : > { %1523 = vmatpush1.bf16.msra.mxu1 %v3935_v26 }
  0x62   : > { %1524 = vmatprep.subr.bf16.mxu1 %v3940_v27 }
  0x63   : > { %3563 = vmatpush3.bf16.msra.mxu0 %v3920_v47 }
  0x64   : > { %3564 = vmatprep.subr.bf16.mxu0 %v3921_v48 }
  0x65   : > { %1525 = vmatpush1.bf16.msra.mxu1 %v3938_v28 }
  0x66   : > { %3648 = vmatprep.subr.bf16.mxu1 %v4069_v43 }
  0x67   : > { %3565 = vmatpush3.bf16.msra.mxu0 %v3922_v49 }
  0x68   : > { %3566 = vmatprep.subr.bf16.mxu0 %v3923_v50 }
  0x6b   : > { %3567 = vmatpush3.bf16.msra.mxu0 %v3924_v52  ;;  %v1471_v52 = vsub.s32 1, %v4326_v41 }
  0x6c   : > { %3568 = vmatprep.subr.bf16.mxu0 %v3925_v54 }
  0x6d   : > { %v1472_v53 = vrot.slane %v1463_v44, %v1471_v52 }
  0x6f   : > { %3569 = vmatpush3.bf16.msra.mxu0 %v3926_v55 }
  0x70   : > { %3570 = vmatprep.subr.bf16.mxu0 %v3927_v56 }
  0x73   : > { %3571 = vmatpush3.bf16.msra.mxu0 %v3928_v57 }
  0x74   : > { %3660 = vmatprep.subr.bf16.mxu0 %v4069_v43 }
  0x76   : > { %1416 = vmatmul.mubr.bf16.vlgmr.msra.gmra.mrb[4].mxu0 %v916_v59 }
  0x77   : > { %3662 = vmatprep.mubr.msk.bf16.mxu0 %vm4070_vm1, %v4069_v43 }
 0x129   : > { %v3528_v60 = vpop.f32.mrb[0].mxu0 }
 0x12a   : > { %v3529_v62 = vpop.f32.mrb[1].mxu0 }
 0x12b   : > { %v3530_v63 = vadd.f32 %v3529_v62, %v3528_v60  ;;  %v3531_v0 = vpop.f32.mrb[2].mxu0  ;;  %v3550_v1 = vpop.f32.mrb[0].mxu1 }
 0x12c   : > { %v3532_v2 = vpop.f32.mrb[3].mxu0  ;;  %v3551_v4 = vpop.f32.mrb[1].mxu1 }
 0x12d   : > { %v1338_v3 = vadd.f32 %v3530_v63, %v1014_v61  ;;  %v3552_v5 = vadd.f32 %v3551_v4, %v3550_v1  ;;  %v3553_v6 = vpop.f32.mrb[2].mxu1  ;;  %v903_v4 = vand.u32 127, %v902_v40 }
 0x12e   : > { %v3554_v7 = vpop.f32.mrb[3].mxu1 }
 0x12f   : > { %v1378_v8 = vadd.f32 %v3552_v5, %v1338_v3  ;;  %vm904_vm4 = vcmp.lt.s32.totalorder %v903_v4, 5  ;;  %v4078_v5 = vmov -1e+30  }
 0x130   : > { %v4374_v6 = vsel %vm904_vm4, 0.0, %v4078_v5 }
 0x149   : > { %v3572_v9 = vpop.f32.mrb[4].mxu0 }
 0x14a   : > { %v3573_v10 = vpop.f32.mrb[5].mxu0 }
 0x14b   : > { %v3574_v11 = vadd.f32 %v3573_v10, %v3572_v9  ;;  %v3575_v12 = vpop.f32.mrb[6].mxu0 }
 0x14c   : > { %v3576_v13 = vpop.f32.mrb[7].mxu0 }
 0x14d   : > { %v4307_v14 = vadd.f32 %v3574_v11, %v1378_v8 }
 0x14f   : > { %v1426_v15 = vsel %vm1425_vm0, %v4307_v14, 0.0 }
 0x150   : > { %1427 = vadd.xlane.f32.xlu0 %v1426_v15 }
 0x1dd   : > { %v1428_v16 = vpop.xlane.xlu0 %1427 }
 0x1de   : > { %v1430_v17 = vmul.f32 0.015625, %v1428_v16 }
 0x1e0   : > { %v1431_v18 = vsub.f32 %v4307_v14, %v1430_v17 }
 0x1e2   : > { %v1432_v19 = vmul.f32 %v1431_v18, %v1431_v18 }
 0x1e4   : > { %v1433_v20 = vsel %vm1425_vm0, %v1432_v19, 0.0 }
 0x1e5   : > { %1434 = vadd.xlane.f32.xlu0 %v1433_v20 }
 0x272   : > { %v1435_v30 = vpop.xlane.xlu0 %1434 }
 0x273   : > { %v1436_v31 = vmul.f32 0.015625, %v1435_v30 }
 0x275   : > { %v1437_v32 = vadd.f32 1e-06, %v1436_v31 }
 0x277   : > { %3985 = vrsqrt.f32 %v1437_v32 }
 0x281   : > { %v3986_v33 = vpop.eup %3985 }
 0x282   : > { %v1439_v35 = vmul.f32 %v3986_v33, %v1431_v18 }
 0x284   : > { %v1446_v37 = vmul.f32 %v3424_v34, %v1439_v35 }
 0x286   : > { %v1453_v38 = vadd.f32 %v3425_v36, %v1446_v37 }
 0x288   : > { %v1454_v39 = vpack.c.bf16 %v1453_v38, %v1453_v38 }
 0x28a   : > { %3434 = vmatmul.mubr.msk.bf16.vlgmr.msra.gmra.mrb[4].mxu1 %vm1425_vm0, %v1454_v39 }
 0x28b   : > { %3650 = vmatprep.mubr.msk.bf16.mxu1 %vm4070_vm1, %v4069_v43 }
 0x35d   : > { %v1552_v46 = vpop.f32.mrb[4].mxu1 }
 0x35e   : > { %v1553_v47 = vadd.f32 %v1552_v46, %v1468_v45  ;;  %v1554_v48 = vpop.f32.mrb[5].mxu1 }
 0x35f   : > { %v1556_v49 = vpop.f32.mrb[6].mxu1  ;;  %v1555_v55 = vadd.f32 %v1554_v48, %v1472_v53 }
 0x360   : > { %v1559_v50 = vpack.c.bf16 %v1553_v47, %v1553_v47  ;;  %v1557_v51 = vpop.f32.mrb[7].mxu1 }
 0x361   : > { %v4350_v58 = vpack.c.bf16 %v1555_v55, %v1555_v55 }
 0x362   : > { %1674 = vrot.lane.b32.xlu0 %v1559_v50, %s4071_s15  ;;  %1562 = vrot.lane.b32.xlu1 %v1559_v50, %s4072_s16 }
 0x363   : > { %v1631_v61 = vsel %vm1629_vm3, %v4350_v58, 0 }
 0x366   : > { %1676 = vrot.lane.b32.xlu1 %v1559_v50, %s4073_s18 }
 0x36a   : > { %1795 = vrot.lane.b32.xlu1 %v1559_v50, %s4074_s22 }
 0x36e   : > { %1793 = vrot.lane.b32.xlu1 %v1559_v50, %s4075_s23 }
 0x372   : > { %1913 = vrot.lane.b32.xlu1 %v1559_v50, %s4076_s26 }
 0x376   : > { %1911 = vrot.lane.b32.xlu1 %v1559_v50, %s4077_s28 }
 0x3d4   : > { %v1563_v54 = vpop.permute.xlu1 %1562  ;;  %v1675_v62 = vpop.permute.xlu0 %1674 }
 0x3d5   : > { %v1569_v56 = vsel %vm1564_vm2, %v1563_v54, 0 }
 0x3d6   : > { %3649 = vmatpush3.bf16.xpose.msra.mxu1 %v1569_v56 }
 0x3d7   : > { %3654 = vmatprep.subr.bf16.mxu1 %v4069_v43 }
 0x3d8   : > { %v1677_v57 = vpop.permute.xlu1 %1676 }
 0x3d9   : > { %v1682_v59 = vsel %vm1564_vm2, %v1677_v57, 0 }
 0x3da   : > { %3661 = vmatpush3.bf16.xpose.msra.mxu0 %v1682_v59 }
 0x3db   : > { %3672 = vmatprep.subr.bf16.mxu0 %v4069_v43 }
 0x3dc   : > { %v1796_v60 = vpop.permute.xlu1 %1795 }
 0x3dd   : > { %3651 = vmatmul.mubr.msk.bf16.vlgmr.msra.gmra.mrb[8].mxu1 %vm1564_vm2, %v1559_v50  ;;  %v1801_v0 = vsel %vm1564_vm2, %v1796_v60, 0 }
 0x3de   : > { %3655 = vmatpush3.bf16.msra.mxu1 %v1631_v61  ;;  %3656 = vmatprep.mubr.msk.bf16.mxu1 %vm4070_vm1, %v4069_v43 }
 0x3df   : > { %3666 = vmatprep.subr.bf16.mxu1 %v4069_v43 }
 0x3e0   : > { %v1794_v63 = vpop.permute.xlu1 %1793 }
 0x3e1   : > { %3663 = vmatmul.mubr.msk.bf16.vlgmr.msra.gmra.mrb[8].mxu0 %vm1564_vm2, %v1675_v62 }
 0x3e2   : > { %3673 = vmatpush3.bf16.xpose.msra.mxu0 %v1801_v0  ;;  %3674 = vmatprep.mubr.msk.bf16.mxu0 %vm4070_vm1, %v4069_v43 }
 0x3e3   : > { %3684 = vmatprep.subr.bf16.mxu0 %v4069_v43 }
 0x3e4   : > { %v1914_v1 = vpop.permute.xlu1 %1913 }
 0x3e5   : > { %v1919_v2 = vsel %vm1564_vm2, %v1914_v1, 0 }
 0x3e8   : > { %v1912_v3 = vpop.permute.xlu1 %1911 }
 0x3e9   : > { %3675 = vmatmul.mubr.msk.bf16.vlgmr.msra.gmra.mrb[12].mxu0 %vm1564_vm2, %v1794_v63 }
 0x3ea   : > { %3685 = vmatpush3.bf16.xpose.msra.mxu0 %v1919_v2  ;;  %3686 = vmatprep.mubr.msk.bf16.mxu0 %vm4070_vm1, %v4069_v43 }
 0x3eb   : > { %3720 = vmatprep.subr.bf16.mxu0 %v4069_v43 }
 0x3f1   : > { %3687 = vmatmul.mubr.msk.bf16.vlgmr.msra.gmra.mrb[16].mxu0 %vm1564_vm2, %v1912_v3 }
 0x3f2   : > { %3736 = vmatprep.mubr.msk.bf16.mxu0 %vm4070_vm1, %v4069_v43 }
 0x4b0   : > { %v1605_v7 = vpop.f32.mrb[8].mxu1 }
 0x4b1   : > { %v1611_v8 = vmul.f32 0.25, %v1605_v7  ;;  %v3652_v9 = vpop.f32.mrb[9].mxu1 }
 0x4b2   : > { %v1608_v10 = vpop.f32.mrb[10].mxu1 }
 0x4b3   : > { %v3653_v11 = vpop.f32.mrb[11].mxu1  ;;  %v1612_v12 = vadd.f32 %v1611_v8, %v4374_v6 }
 0x4b4   : > { %v1718_v13 = vpop.f32.mrb[8].mxu0 }
 0x4b5   : > { %v1724_v15 = vmul.f32 0.25, %v1718_v13  ;;  %v3664_v16 = vpop.f32.mrb[9].mxu0  ;;  %v1614_v17 = vsel %vm1613_vm5, %v1612_v12, -inf }
 0x4b6   : > { %1615 = vmax.xlane.f32.xlu1 %v1614_v17  ;;  %v1721_v18 = vpop.f32.mrb[10].mxu0 }
 0x4b7   : > { %v3665_v19 = vpop.f32.mrb[11].mxu0  ;;  %v1725_v20 = vadd.f32 %v1724_v15, %v4374_v6 }
 0x4b9   : > { %v1726_v21 = vsel %vm1613_vm5, %v1725_v20, -inf }
 0x4ba   : > { %1727 = vmax.xlane.f32.xlu0 %v1726_v21 }
 0x4bc   : > { %v1837_v22 = vpop.f32.mrb[12].mxu0 }
 0x4bd   : > { %v1843_v23 = vmul.f32 0.25, %v1837_v22  ;;  %v3676_v24 = vpop.f32.mrb[13].mxu0 }
 0x4be   : > { %v1840_v25 = vpop.f32.mrb[14].mxu0 }
 0x4bf   : > { %v3677_v26 = vpop.f32.mrb[15].mxu0  ;;  %v1844_v27 = vadd.f32 %v1843_v23, %v4374_v6 }
 0x4c1   : > { %v1845_v28 = vsel %vm1613_vm5, %v1844_v27, -inf }
 0x4c2   : > { %1846 = vmax.xlane.f32.xlu1 %v1845_v28 }
 0x4c4   : > { %v1955_v30 = vpop.f32.mrb[16].mxu0 }
 0x4c5   : > { %v1961_v31 = vmul.f32 0.25, %v1955_v30  ;;  %v3688_v32 = vpop.f32.mrb[17].mxu0  ;;  %v3941_v30 = vld [vmem:[%s4122_s3] sm:$0xff]  }
 0x4c6   : > { %v1958_v33 = vpop.f32.mrb[18].mxu0  ;;  %v3943_v32 = vld [vmem:[%s4122_s3 + $0x10] sm:$0xff]  }
 0x4c7   : > { %v3689_v34 = vpop.f32.mrb[19].mxu0  ;;  %v1962_v35 = vadd.f32 %v1961_v31, %v4374_v6  ;;  %v3942_v31 = vld [vmem:[%s4122_s3 + $0x8] sm:$0xff]   ;;  %v3944_v33 = vld [vmem:[%s4122_s3 + $0x18] sm:$0xff]  }
 0x4c9   : > { %v1963_v36 = vsel %vm1613_vm5, %v1962_v35, -inf }
 0x4ca   : > { %1964 = vmax.xlane.f32.xlu0 %v1963_v36 }
 0x543   : > { %v1616_v37 = vpop.xlane.xlu1 %1615 }
 0x544   : > { %v1617_v38 = vsub.f32 %v1612_v12, %v1616_v37 }
 0x546   : > { %v1618_v39 = vmul.f32 1.442695, %v1617_v38 }
 0x547   : > { %v1728_v40 = vpop.xlane.xlu0 %1727 }
 0x548   : > { %3987 = vpow2.f32 %v1618_v39  ;;  %v1729_v44 = vsub.f32 %v1725_v20, %v1728_v40 }
 0x54a   : > { %v1730_v45 = vmul.f32 1.442695, %v1729_v44 }
 0x54c   : > { %3989 = vpow2.f32 %v1730_v45 }
 0x54f   : > { %v1847_v56 = vpop.xlane.xlu1 %1846 }
 0x550   : > { %v1848_v57 = vsub.f32 %v1844_v27, %v1847_v56 }
 0x552   : > { %v3988_v46 = vpop.eup %3987  ;;  %v1849_v59 = vmul.f32 1.442695, %v1848_v57 }
 0x553   : > { %v1620_v47 = vsel %vm1613_vm5, %v3988_v46, 0.0 }
 0x554   : > { %1621 = vadd.xlane.f32.xlu1 %v1620_v47 }
 0x556   : > { %v3990_v48 = vpop.eup %3989 }
 0x557   : > { %v1965_v49 = vpop.xlane.xlu0 %1964  ;;  %v1732_v50 = vsel %vm1613_vm5, %v3990_v48, 0.0 }
 0x558   : > { %v1966_v51 = vsub.f32 %v1962_v35, %v1965_v49  ;;  %1733 = vadd.xlane.f32.xlu0 %v1732_v50  ;;  %v3443_v50 = vld [vmem:[%s4127_s8] ss:$0 sm:$0xff] }
 0x55a   : > { %v1967_v53 = vmul.f32 1.442695, %v1966_v51 }
 0x55c   : > { %3991 = vpow2.f32 %v1967_v53 }
 0x55d   : > { %3993 = vpow2.f32 %v1849_v59 }
 0x565   : > { %1739 = vrot.lane.b32.xlu1 %v4350_v58, %s4071_s15 }
 0x566   : > { %v3992_v54 = vpop.eup %3991 }
 0x567   : > { %v1969_v55 = vsel %vm1613_vm5, %v3992_v54, 0.0  ;;  %v3994_v60 = vpop.eup %3993 }
 0x568   : > { %1970 = vadd.xlane.f32.xlu0 %v1969_v55  ;;  %v1851_v61 = vsel %vm1613_vm5, %v3994_v60, 0.0 }
 0x57e   : > { %1857 = vrot.lane.b32.xlu0 %v4350_v58, %s4075_s23 }
 0x589   : > { %1852 = vadd.xlane.f32.xlu1 %v1851_v61 }
 0x59a   : > { %1975 = vrot.lane.b32.xlu1 %v4350_v58, %s4077_s28 }
 0x5e1   : > { %v1622_v62 = vpop.xlane.xlu1 %1621 }
 0x5e2   : > { %3995 = vrcp.f32 %v1622_v62 }
 0x5e5   : > { %v1734_v63 = vpop.xlane.xlu0 %1733  ;;  %v1740_v2 = vpop.permute.xlu1 %1739 }
 0x5e6   : > { %3997 = vrcp.f32 %v1734_v63  ;;  %v1745_v5 = vsel %vm1629_vm3, %v1740_v2, 0  ;;  %v3947_v2 = vld [vmem:[%s4142_s24 + $0x10] sm:$0xff]  }
 0x5ec   : > { %v3996_v0 = vpop.eup %3995 }
 0x5ed   : > { %v1624_v1 = vmul.f32 %v3996_v0, %v3988_v46 }
 0x5ef   : > { %v1625_v3 = vpack.c.bf16 %v1624_v1, %v1624_v1  ;;  %v3945_v1 = vld [vmem:[%s4142_s24] sm:$0xff]  }
 0x5f0   : > { %v3998_v4 = vpop.eup %3997 }
 0x5f1   : > { %3657 = vmatmul.mubr.msk.bf16.vlgmr.msra.gmra.mrb[12].mxu1 %vm1613_vm5, %v1625_v3  ;;  %v1736_v7 = vmul.f32 %v3998_v4, %v3990_v48  ;;  %v3948_v3 = vld [vmem:[%s4142_s24 + $0x18] sm:$0xff]   ;;  %v3949_v4 = vld [vmem:[%s4152_s6] sm:$0xff]  }
 0x5f2   : > { %3667 = vmatpush3.bf16.msra.mxu1 %v1745_v5  ;;  %3668 = vmatprep.mubr.msk.bf16.mxu1 %vm4070_vm1, %v4069_v43  ;;  %v3950_v5 = vld [vmem:[%s4152_s6 + $0x8] sm:$0xff]  }
 0x5f3   : > { %3678 = vmatprep.subr.bf16.mxu1 %v4069_v43  ;;  %v1737_v8 = vpack.c.bf16 %v1736_v7, %v1736_v7  ;;  %3721 = vmatpush3.bf16.msra.mxu0 %v3949_v4  ;;  %v3951_v7 = vld [vmem:[%s4152_s6 + $0x10] sm:$0xff]  }
 0x5f4   : > { %3722 = vmatprep.subr.bf16.mxu0 %v4069_v43 }
 0x5f5   : > { %v1971_v58 = vpop.xlane.xlu0 %1970 }
 0x5f7   : > { %3723 = vmatpush3.bf16.msra.mxu0 %v3950_v5 }
 0x5f8   : > { %3724 = vmatprep.subr.bf16.mxu0 %v4069_v43 }
 0x5f9   : > { %v1858_v9 = vpop.permute.xlu0 %1857  ;;  %3669 = vmatmul.mubr.msk.bf16.vlgmr.msra.gmra.mrb[16].mxu1 %vm1613_vm5, %v1737_v8 }
 0x5fa   : > { %v1863_v10 = vsel %vm1629_vm3, %v1858_v9, 0  ;;  %3680 = vmatprep.mubr.msk.bf16.mxu1 %vm4070_vm1, %v4069_v43 }
 0x5fb   : > { %3679 = vmatpush3.bf16.msra.mxu1 %v1863_v10  ;;  %3725 = vmatpush3.bf16.msra.mxu0 %v3951_v7 }
 0x5fc   : > { %3690 = vmatprep.subr.bf16.mxu1 %v4069_v43  ;;  %3726 = vmatprep.subr.bf16.mxu0 %v4069_v43 }
 0x616   : > { %v1853_v11 = vpop.xlane.xlu1 %1852 }
 0x617   : > { %3999 = vrcp.f32 %v1853_v11  ;;  %v3449_v11 = vld [vmem:[%s4132_s14] ss:$0 sm:$0xff] }
 0x618   : > { %4001 = vrcp.f32 %v1971_v58 }
 0x61a   : > { %v1976_v15 = vpop.permute.xlu1 %1975 }
 0x61b   : > { %v1981_v18 = vsel %vm1629_vm3, %v1976_v15, 0 }
 0x621   : > { %v4000_v12 = vpop.eup %3999 }
 0x622   : > { %v1855_v13 = vmul.f32 %v4000_v12, %v3994_v60  ;;  %v4002_v17 = vpop.eup %4001 }
 0x623   : > { %v1973_v19 = vmul.f32 %v4002_v17, %v3992_v54 }
 0x624   : > { %v1856_v16 = vpack.c.bf16 %v1855_v13, %v1855_v13  ;;  %v3450_v13 = vld [vmem:[%s4137_s19] ss:$0 sm:$0xff] }
 0x625   : > { %v1974_v20 = vpack.c.bf16 %v1973_v19, %v1973_v19  ;;  %v3953_v19 = vld [vmem:[%s4152_s6 + $0x20] sm:$0xff]  }
 0x626   : > { %3681 = vmatmul.mubr.msk.bf16.vlgmr.msra.gmra.mrb[20].mxu1 %vm1613_vm5, %v1856_v16 }
 0x627   : > { %3691 = vmatpush3.bf16.msra.mxu1 %v1981_v18  ;;  %3692 = vmatprep.mubr.msk.bf16.mxu1 %vm4070_vm1, %v4069_v43  ;;  %v3952_v18 = vld [vmem:[%s4152_s6 + $0x18] sm:$0xff]  }
 0x628   : > { %3696 = vmatprep.subr.bf16.mxu1 %v4069_v43  ;;  %3727 = vmatpush3.bf16.msra.mxu0 %v3952_v18 }
 0x629   : > { %3728 = vmatprep.subr.bf16.mxu0 %v4069_v43 }
 0x62c   : > { %3729 = vmatpush3.bf16.msra.mxu0 %v3953_v19 }
 0x62d   : > { %3730 = vmatprep.subr.bf16.mxu0 %v4069_v43 }
 0x62e   : > { %3693 = vmatmul.mubr.msk.bf16.vlgmr.msra.gmra.mrb[24].mxu1 %vm1613_vm5, %v1974_v20  ;;  %v3954_v20 = vld [vmem:[%s4152_s6 + $0x28] sm:$0xff]  }
 0x62f   : > { %3704 = vmatprep.mubr.msk.bf16.mxu1 %vm4070_vm1, %v4069_v43  ;;  %3697 = vmatpush3.bf16.msra.mxu1 %v3941_v30 }
 0x630   : > { %3698 = vmatprep.subr.bf16.mxu1 %v4069_v43  ;;  %3731 = vmatpush3.bf16.msra.mxu0 %v3954_v20 }
 0x631   : > { %3732 = vmatprep.subr.bf16.mxu0 %v4069_v43 }
 0x633   : > { %3699 = vmatpush3.bf16.msra.mxu1 %v3942_v31 }
 0x634   : > { %3700 = vmatprep.subr.bf16.mxu1 %v4069_v43 }
 0x637   : > { %3701 = vmatpush3.bf16.msra.mxu1 %v3943_v32 }
 0x638   : > { %3702 = vmatprep.subr.bf16.mxu1 %v4069_v43 }
 0x63b   : > { %3703 = vmatpush3.bf16.msra.mxu1 %v3944_v33 }
 0x63c   : > { %3708 = vmatprep.subr.bf16.mxu1 %v4069_v43 }
 0x6c4   : > { %v1667_v21 = vpop.f32.mrb[12].mxu1 }
 0x6c5   : > { %1673 = vst.msk [vmem:[#allocation2] sm:$0xff] %vm1564_vm2, %v1667_v21  ;;  %v3658_v22 = vpop.f32.mrb[13].mxu1  ;;  %v3955_v21 = vld [vmem:[%s4152_s6 + $0x30] sm:$0xff]  }
 0x6c6   : > { %v1670_v23 = vpop.f32.mrb[14].mxu1  ;;  %3733 = vmatpush3.bf16.msra.mxu0 %v3955_v21  ;;  %v3956_v22 = vld [vmem:[%s4152_s6 + $0x38] sm:$0xff]  }
 0x6c7   : > { %v3659_v24 = vpop.f32.mrb[15].mxu1  ;;  %3734 = vmatprep.subr.bf16.mxu0 %v4069_v43 }
 0x6ca   : > { %3735 = vmatpush3.bf16.msra.mxu0 %v3956_v22 }
 0x6cb   : > { %3752 = vmatprep.subr.bf16.mxu0 %v4069_v43 }
 0x6cc   : > { %v1781_v25 = vpop.f32.mrb[16].mxu1 }
 0x6cd   : > { %1788 = vrot.lane.b32.xlu1 %v1781_v25, %s4076_s26  ;;  %v3670_v26 = vpop.f32.mrb[17].mxu1 }
 0x6ce   : > { %v1784_v27 = vpop.f32.mrb[18].mxu1 }
 0x6cf   : > { %v3671_v28 = vpop.f32.mrb[19].mxu1 }
 0x6f9   : > { %v1899_v34 = vpop.f32.mrb[20].mxu1 }
 0x6fa   : > { %1906 = vrot.lane.b32.xlu0 %v1899_v34, %s4074_s22  ;;  %v3682_v35 = vpop.f32.mrb[21].mxu1 }
 0x6fb   : > { %v1902_v36 = vpop.f32.mrb[22].mxu1  ;;  %v3457_v35 = vld [vmem:[%s4644_s1] ss:$0 sm:$0xff]  ;;  %s4648_s1 = sld [smem:[#allocation7_spill]] }
 0x6fc   : > { %v3683_v37 = vpop.f32.mrb[23].mxu1 }
 0x701   : > { %v2017_v38 = vpop.f32.mrb[24].mxu1  ;;  %v2382_v7 = vld [vmem:[%s4648_s1] sm:$0x3] }
 0x702   : > { %2024 = vrot.lane.b32.xlu1 %v2017_v38, %s4073_s18  ;;  %v3694_v39 = vpop.f32.mrb[25].mxu1 }
 0x703   : > { %v2020_v40 = vpop.f32.mrb[26].mxu1 }
 0x704   : > { %v3695_v44 = vpop.f32.mrb[27].mxu1 }
 0x73f   : > { %v1789_v45 = vpop.permute.xlu1 %1788 }
 0x740   : > { %1792 = vst.msk [vmem:[#allocation2] sm:$0xff] %vm1791_vm6, %v1789_v45 }
 0x76c   : > { %v1907_v46 = vpop.permute.xlu0 %1906 }
 0x76d   : > { %1910 = vst.msk [vmem:[#allocation2] sm:$0xff] %vm1909_vm7, %v1907_v46 }
 0x774   : > { %v2025_v47 = vpop.permute.xlu1 %2024 }
 0x775   : > { %2028 = vst.msk [vmem:[#allocation2] sm:$0xff] %vm2027_vm8, %v2025_v47 }
 0x77c   : > { %v2029_v48 = vld [vmem:[#allocation2] sm:$0xff] }
 0x77d   : > { %v2030_v49 = vpack.c.bf16 %v2029_v48, %v2029_v48 }
 0x77f   : > { %3705 = vmatmul.mubr.msk.bf16.vlgmr.msra.gmra.mrb[28].mxu1 %vm1425_vm0, %v2030_v49 }
 0x780   : > { %3716 = vmatprep.mubr.msk.bf16.mxu1 %vm4070_vm1, %v4069_v43  ;;  %3709 = vmatpush3.bf16.msra.mxu1 %v3945_v1  ;;  %v3466_v1 = vld [vmem:[%s4646_s0] ss:$0 sm:$0xff]  ;;  %s3375_s0 = sshll.u32 %s4657_s10, 3 }
 0x781   : > { %3710 = vmatprep.subr.bf16.mxu1 %v4069_v43 }
 0x852   : > { %v2107_v51 = vpop.f32.mrb[28].mxu1 }
 0x853   : > { %v2108_v53 = vadd.f32 %v3443_v50, %v2107_v51  ;;  %v3706_v54 = vpop.f32.mrb[29].mxu1  ;;  %v3959_v51 = vld [vmem:[%s4645_s2 + $0x4] ss:$8 sps:$4 sm:$0xff]  }
 0x854   : > { %v2110_v55 = vpop.f32.mrb[30].mxu1  ;;  %v3962_v54 = vld [vmem:[%s4645_s2 + $0x14] ss:$8 sps:$4 sm:$0xff]  }
 0x855   : > { %v4432_v56 = vadd.f32 %v2108_v53, %v4307_v14  ;;  %v3707_v57 = vpop.f32.mrb[31].mxu1  ;;  %v3946_v14 = vld [vmem:[%s4142_s24 + $0x8] sm:$0xff]   ;;  %v3960_v55 = vld [vmem:[%s4645_s2 + $0x10] ss:$8 sps:$4 sm:$0xff]  }
 0x856   : > { %3711 = vmatpush3.bf16.msra.mxu1 %v3946_v14  ;;  %v3957_v53 = vld [vmem:[%s4645_s2] ss:$8 sps:$4 sm:$0xff]  }
 0x857   : > { %v2116_v59 = vsel %vm1425_vm0, %v4432_v56, 0.0  ;;  %3712 = vmatprep.subr.bf16.mxu1 %v4069_v43  ;;  %v3963_v57 = vld [vmem:[%s4645_s2 + $0x20] ss:$8 sps:$4 sm:$0xff]  }
 0x858   : > { %2117 = vadd.xlane.f32.xlu0 %v2116_v59  ;;  %v3968_v59 = vld [vmem:[%s4645_s2 + $0x34] ss:$8 sps:$4 sm:$0xff]  }
 0x85a   : > { %3713 = vmatpush3.bf16.msra.mxu1 %v3947_v2  ;;  %v3467_v2 = vld [vmem:[%s4647_s11] ss:$0 sm:$0xff]  ;;  %s900_s11 = scalar_lea.vmem %s4232_s4, %s3375_s0 }
 0x85b   : > { %3714 = vmatprep.subr.bf16.mxu1 %v4069_v43 }
 0x85e   : > { %3715 = vmatpush3.bf16.msra.mxu1 %v3948_v3 }
 0x85f   : > { %2437 = vmatprep.subr.bf16.mxu1 %v3959_v51 }
 0x8e5   : > { %v2118_v60 = vpop.xlane.xlu0 %2117 }
 0x8e6   : > { %v2119_v61 = vmul.f32 0.015625, %v2118_v60  ;;  %v3966_v60 = vld [vmem:[%s4645_s2 + $0x30] ss:$8 sps:$4 sm:$0xff]  }
 0x8e8   : > { %v2120_v62 = vsub.f32 %v4432_v56, %v2119_v61 }
 0x8ea   : > { %v2121_v63 = vmul.f32 %v2120_v62, %v2120_v62 }
 0x8ec   : > { %v2122_v0 = vsel %vm1425_vm0, %v2121_v63, 0.0 }
 0x8ed   : > { %2123 = vadd.xlane.f32.xlu1 %v2122_v0 }
 0x97a   : > { %v2124_v58 = vpop.xlane.xlu1 %2123 }
 0x97b   : > { %v2125_v8 = vmul.f32 0.015625, %v2124_v58  ;;  %v2387_v58 = vrot.slane %v2382_v7, %v1467_v42  ;;  %v2391_v42 = vrot.slane %v2382_v7, %v1471_v52 }
 0x97d   : > { %v2126_v9 = vadd.f32 1e-06, %v2125_v8 }
 0x97f   : > { %4003 = vrsqrt.f32 %v2126_v9 }
 0x989   : > { %v4004_v10 = vpop.eup %4003 }
 0x98a   : > { %v2128_v12 = vmul.f32 %v4004_v10, %v2120_v62 }
 0x98c   : > { %v2135_v15 = vmul.f32 %v3449_v11, %v2128_v12 }
 0x98e   : > { %v2142_v16 = vadd.f32 %v3450_v13, %v2135_v15 }
 0x990   : > { %v2143_v17 = vpack.c.bf16 %v2142_v16, %v2142_v16 }
 0x992   : > { %3717 = vmatmul.mubr.msk.bf16.vlgmr.msra.gmra.mrb[32].mxu1 %vm1425_vm0, %v2143_v17 }
 0x993   : > { %2469 = vmatprep.mubr.bf16.mxu1 %v4068_v29  ;;  %v3451_v29 = vld [vmem:[%s4147_s30] ss:$0 sm:$0xff]  ;;  %2438 = vmatpush1.bf16.msra.mxu1 %v3957_v53 }
 0x994   : > { %2439 = vmatprep.subr.bf16.mxu1 %v3962_v54 }
 0x997   : > { %2440 = vmatpush1.bf16.msra.mxu1 %v3960_v55 }
 0xa65   : > { %v2220_v23 = vpop.f32.mrb[32].mxu1 }
 0xa66   : > { %v2221_v24 = vadd.f32 %v3451_v29, %v2220_v23  ;;  %v3718_v25 = vpop.f32.mrb[33].mxu1 }
 0xa67   : > { %v2223_v26 = vpop.f32.mrb[34].mxu1 }
 0xa68   : > { %v2227_v27 = vmul.f32 0.70710677, %v2221_v24  ;;  %v3719_v28 = vpop.f32.mrb[35].mxu1  ;;  %v2226_v31 = vmul.f32 0.5, %v2221_v24 }
 0xa6a   : > { %4005 = verf.f32 %v2227_v27 }
 0xa74   : > { %v4006_v30 = vpop.eup %4005 }
 0xa75   : > { %v2229_v32 = vadd.f32 1.0, %v4006_v30 }
 0xa77   : > { %v2230_v33 = vmul.f32 %v2229_v32, %v2226_v31 }
 0xa79   : > { %v2231_v34 = vpack.c.bf16 %v2230_v33, %v2230_v33 }
 0xa7b   : > { %3737 = vmatmul.mubr.bf16.vlgmr.msra.gmra.mrb[20].mxu0 %v2231_v34 }
 0xa7c   : > { %3754 = vmatprep.mubr.msk.bf16.mxu0 %vm4070_vm1, %v4069_v43 }
 0xb4e   : > { %v2337_v36 = vpop.f32.mrb[20].mxu0 }
 0xb4f   : > { %v2338_v37 = vadd.f32 %v3457_v35, %v2337_v36  ;;  %v3738_v38 = vpop.f32.mrb[21].mxu0 }
 0xb50   : > { %v2340_v39 = vpop.f32.mrb[22].mxu0 }
 0xb51   : > { %v4470_v40 = vadd.f32 %v2338_v37, %v4432_v56  ;;  %v3739_v44 = vpop.f32.mrb[23].mxu0  ;;  %v3965_v56 = vld [vmem:[%s4645_s2 + $0x24] ss:$8 sps:$4 sm:$0xff]  }
 0xb52   : > { %2441 = vmatprep.subr.bf16.mxu1 %v3965_v56 }
 0xb53   : > { %v2346_v45 = vsel %vm1425_vm0, %v4470_v40, 0.0  ;;  %2442 = vmatpush1.bf16.msra.mxu1 %v3963_v57 }
 0xb54   : > { %2347 = vadd.xlane.f32.xlu0 %v2346_v45  ;;  %2443 = vmatprep.subr.bf16.mxu1 %v3968_v59 }
 0xb57   : > { %2444 = vmatpush1.bf16.msra.mxu1 %v3966_v60 }
 0xb58   : > { %3740 = vmatprep.subr.bf16.mxu1 %v4069_v43 }
 0xbe1   : > { %v2348_v46 = vpop.xlane.xlu0 %2347 }
 0xbe2   : > { %v2349_v47 = vmul.f32 0.015625, %v2348_v46 }
 0xbe4   : > { %v2350_v48 = vsub.f32 %v4470_v40, %v2349_v47 }
 0xbe6   : > { %v2351_v49 = vmul.f32 %v2350_v48, %v2350_v48 }
 0xbe8   : > { %v2352_v50 = vsel %vm1425_vm0, %v2351_v49, 0.0 }
 0xbe9   : > { %2353 = vadd.xlane.f32.xlu0 %v2352_v50 }
 0xc76   : > { %v2354_v61 = vpop.xlane.xlu0 %2353 }
 0xc77   : > { %v2355_v62 = vmul.f32 0.015625, %v2354_v61 }
 0xc79   : > { %v2356_v63 = vadd.f32 1e-06, %v2355_v62 }
 0xc7b   : > { %4007 = vrsqrt.f32 %v2356_v63 }
 0xc85   : > { %v4008_v0 = vpop.eup %4007 }
 0xc86   : > { %v2358_v14 = vmul.f32 %v4008_v0, %v2350_v48 }
 0xc88   : > { %v2365_v3 = vmul.f32 %v3466_v1, %v2358_v14 }
 0xc8a   : > { %v2372_v4 = vadd.f32 %v3467_v2, %v2365_v3 }
 0xc8c   : > { %v2373_v5 = vpack.c.bf16 %v2372_v4, %v2372_v4 }
 0xc8e   : > { %3476 = vmatmul.mubr.msk.bf16.vlgmr.msra.gmra.mrb[36].mxu1 %vm1425_vm0, %v2373_v5 }
 0xc8f   : > { %3742 = vmatprep.mubr.msk.bf16.mxu1 %vm4070_vm1, %v4069_v43 }
 0xd61   : > { %v2471_v8 = vpop.f32.mrb[36].mxu1 }
 0xd62   : > { %v2472_v9 = vadd.f32 %v2471_v8, %v2387_v58  ;;  %v2473_v10 = vpop.f32.mrb[37].mxu1 }
 0xd63   : > { %v2475_v11 = vpop.f32.mrb[38].mxu1  ;;  %v2474_v17 = vadd.f32 %v2473_v10, %v2391_v42 }
 0xd64   : > { %v2478_v12 = vpack.c.bf16 %v2472_v9, %v2472_v9  ;;  %v2476_v13 = vpop.f32.mrb[39].mxu1 }
 0xd65   : > { %v4506_v21 = vpack.c.bf16 %v2474_v17, %v2474_v17 }
 0xd66   : > { %2592 = vrot.lane.b32.xlu0 %v2478_v12, %s4073_s18  ;;  %2481 = vrot.lane.b32.xlu1 %v2478_v12, %s4072_s16  ;;  %s4650_s16 = sld [smem:[#allocation9_spill]] }
 0xd67   : > { %v2547_v52 = vsel %vm1629_vm3, %v4506_v21, 0 }
 0xd6a   : > { %2708 = vrot.lane.b32.xlu0 %v2478_v12, %s4075_s23  ;;  %2590 = vrot.lane.b32.xlu1 %v2478_v12, %s4071_s15 }
 0xd6e   : > { %2825 = vrot.lane.b32.xlu0 %v2478_v12, %s4077_s28  ;;  %2710 = vrot.lane.b32.xlu1 %v2478_v12, %s4074_s22 }
 0xd72   : > { %2827 = vrot.lane.b32.xlu1 %v2478_v12, %s4076_s26 }
 0xdd8   : > { %v2593_v15 = vpop.permute.xlu0 %2592  ;;  %v2482_v16 = vpop.permute.xlu1 %2481 }
 0xdd9   : > { %v2598_v18 = vsel %vm1564_vm2, %v2593_v15, 0  ;;  %v2487_v19 = vsel %vm1564_vm2, %v2482_v16, 0 }
 0xdda   : > { %3741 = vmatpush3.bf16.xpose.msra.mxu1 %v2487_v19  ;;  %3753 = vmatpush3.bf16.xpose.msra.mxu0 %v2598_v18 }
 0xddb   : > { %3746 = vmatprep.subr.bf16.mxu1 %v4069_v43  ;;  %3764 = vmatprep.subr.bf16.mxu0 %v4069_v43 }
 0xddc   : > { %v2591_v20 = vpop.permute.xlu1 %2590  ;;  %v2709_v23 = vpop.permute.xlu0 %2708 }
 0xde0   : > { %v2711_v22 = vpop.permute.xlu1 %2710  ;;  %v2826_v25 = vpop.permute.xlu0 %2825 }
 0xde1   : > { %v2716_v41 = vsel %vm1564_vm2, %v2711_v22, 0  ;;  %3743 = vmatmul.mubr.msk.bf16.vlgmr.msra.gmra.mrb[40].mxu1 %vm1564_vm2, %v2478_v12  ;;  %3755 = vmatmul.mubr.msk.bf16.vlgmr.msra.gmra.mrb[24].mxu0 %vm1564_vm2, %v2591_v20 }
 0xde2   : > { %3747 = vmatpush3.bf16.msra.mxu1 %v2547_v52  ;;  %3765 = vmatpush3.bf16.xpose.msra.mxu0 %v2716_v41 }
 0xde3   : > { %3766 = vmatprep.mubr.msk.bf16.mxu0 %vm4070_vm1, %v4069_v43  ;;  %3776 = vmatprep.subr.bf16.mxu0 %v4069_v43 }
 0xde4   : > { %3748 = vmatprep.mubr.msk.bf16.mxu1 %vm4070_vm1, %v4069_v43  ;;  %3758 = vmatprep.subr.bf16.mxu1 %v4069_v43  ;;  %v2828_v29 = vpop.permute.xlu1 %2827 }
 0xde5   : > { %v2833_v24 = vsel %vm1564_vm2, %v2828_v29, 0 }
 0xde9   : > { %3767 = vmatmul.mubr.msk.bf16.vlgmr.msra.gmra.mrb[28].mxu0 %vm1564_vm2, %v2709_v23 }
 0xdea   : > { %3777 = vmatpush3.bf16.xpose.msra.mxu0 %v2833_v24  ;;  %3778 = vmatprep.mubr.msk.bf16.mxu0 %vm4070_vm1, %v4069_v43 }
 0xdeb   : > { %3788 = vmatprep.subr.bf16.mxu0 %v4069_v43 }
 0xdf1   : > { %3779 = vmatmul.mubr.msk.bf16.vlgmr.msra.gmra.mrb[32].mxu0 %vm1564_vm2, %v2826_v25 }
 0xdf2   : > { %3796 = vmatprep.mubr.msk.bf16.mxu0 %vm4070_vm1, %v4069_v43 }
 0xeb4   : > { %v2523_v26 = vpop.f32.mrb[40].mxu1  ;;  %v2634_v27 = vpop.f32.mrb[24].mxu0 }
 0xeb5   : > { %v2529_v28 = vmul.f32 0.25, %v2523_v26  ;;  %v2640_v30 = vmul.f32 0.25, %v2634_v27  ;;  %v3744_v31 = vpop.f32.mrb[41].mxu1  ;;  %v3756_v32 = vpop.f32.mrb[25].mxu0 }
 0xeb6   : > { %v2526_v33 = vpop.f32.mrb[42].mxu1  ;;  %v2637_v34 = vpop.f32.mrb[26].mxu0 }
 0xeb7   : > { %v3745_v35 = vpop.f32.mrb[43].mxu1  ;;  %v3757_v36 = vpop.f32.mrb[27].mxu0  ;;  %v2530_v37 = vadd.f32 %v2529_v28, %v4374_v6  ;;  %v2641_v38 = vadd.f32 %v2640_v30, %v4374_v6 }
 0xeb9   : > { %v2531_v39 = vsel %vm1613_vm5, %v2530_v37, -inf  ;;  %v2642_v44 = vsel %vm1613_vm5, %v2641_v38, -inf }
 0xeba   : > { %2532 = vmax.xlane.f32.xlu1 %v2531_v39  ;;  %2643 = vmax.xlane.f32.xlu0 %v2642_v44 }
 0xebc   : > { %v2752_v45 = vpop.f32.mrb[28].mxu0 }
 0xebd   : > { %v2758_v46 = vmul.f32 0.25, %v2752_v45  ;;  %v3768_v47 = vpop.f32.mrb[29].mxu0 }
 0xebe   : > { %v2755_v48 = vpop.f32.mrb[30].mxu0 }
 0xebf   : > { %v3769_v49 = vpop.f32.mrb[31].mxu0  ;;  %v2759_v50 = vadd.f32 %v2758_v46, %v4374_v6 }
 0xec1   : > { %v2760_v51 = vsel %vm1613_vm5, %v2759_v50, -inf }
 0xec2   : > { %2761 = vmax.xlane.f32.xlu0 %v2760_v51 }
 0xec4   : > { %v2869_v53 = vpop.f32.mrb[32].mxu0 }
 0xec5   : > { %v2875_v54 = vmul.f32 0.25, %v2869_v53  ;;  %v3780_v55 = vpop.f32.mrb[33].mxu0 }
 0xec6   : > { %v2872_v56 = vpop.f32.mrb[34].mxu0 }
 0xec7   : > { %v3781_v57 = vpop.f32.mrb[35].mxu0  ;;  %v2876_v59 = vadd.f32 %v2875_v54, %v4374_v6 }
 0xec9   : > { %v2877_v60 = vsel %vm1613_vm5, %v2876_v59, -inf }
 0xeca   : > { %2878 = vmax.xlane.f32.xlu1 %v2877_v60 }
 0xf47   : > { %v2644_v61 = vpop.xlane.xlu0 %2643  ;;  %v2533_v62 = vpop.xlane.xlu1 %2532 }
 0xf48   : > { %v2645_v63 = vsub.f32 %v2641_v38, %v2644_v61  ;;  %v2534_v0 = vsub.f32 %v2530_v37, %v2533_v62 }
 0xf4a   : > { %v2646_v1 = vmul.f32 1.442695, %v2645_v63  ;;  %v2535_v14 = vmul.f32 1.442695, %v2534_v0 }
 0xf4c   : > { %4009 = vpow2.f32 %v2646_v1 }
 0xf4d   : > { %4011 = vpow2.f32 %v2535_v14  ;;  %v3485_v14 = vld [vmem:[%s4650_s16] ss:$0 sm:$0xff] }
 0xf4f   : > { %v2762_v2 = vpop.xlane.xlu0 %2761 }
 0xf50   : > { %v2763_v3 = vsub.f32 %v2759_v50, %v2762_v2 }
 0xf52   : > { %v2764_v4 = vmul.f32 1.442695, %v2763_v3 }
 0xf54   : > { %4013 = vpow2.f32 %v2764_v4 }
 0xf56   : > { %v4010_v5 = vpop.eup %4009 }
 0xf57   : > { %v4012_v7 = vpop.eup %4011  ;;  %v2648_v58 = vsel %vm1613_vm5, %v4010_v5, 0.0  ;;  %v2879_v10 = vpop.xlane.xlu1 %2878 }
 0xf58   : > { %2649 = vadd.xlane.f32.xlu1 %v2648_v58  ;;  %v2537_v6 = vsel %vm1613_vm5, %v4012_v7, 0.0  ;;  %v2880_v11 = vsub.f32 %v2876_v59, %v2879_v10 }
 0xf59   : > { %2538 = vadd.xlane.f32.xlu0 %v2537_v6 }
 0xf5a   : > { %v2881_v12 = vmul.f32 1.442695, %v2880_v11 }
 0xf5c   : > { %4015 = vpow2.f32 %v2881_v12 }
 0xf5e   : > { %v4014_v8 = vpop.eup %4013 }
 0xf5f   : > { %v2766_v9 = vsel %vm1613_vm5, %v4014_v8, 0.0 }
 0xf60   : > { %2767 = vadd.xlane.f32.xlu0 %v2766_v9 }
 0xf66   : > { %v4016_v13 = vpop.eup %4015 }
 0xf67   : > { %v2883_v42 = vsel %vm1613_vm5, %v4016_v13, 0.0 }
 0xf69   : > { %2772 = vrot.lane.b32.xlu1 %v4506_v21, %s4075_s23  ;;  %s4653_s23 = sld [smem:[#allocation10_spill]] }
 0xf76   : > { %2655 = vrot.lane.b32.xlu0 %v4506_v21, %s4071_s15  ;;  %s4649_s15 = sld [smem:[#allocation8_spill]] }
 0xf7c   : > { %v3969_v39 = vld [vmem:[%s4649_s15] sm:$0xff]   ;;  %v3970_v44 = vld [vmem:[%s4649_s15 + $0x8] sm:$0xff]   ;;  %v3971_v54 = vld [vmem:[%s4649_s15 + $0x10] sm:$0xff]  }
 0xf7d   : > { %3789 = vmatpush3.bf16.msra.mxu0 %v3969_v39  ;;  %v3972_v55 = vld [vmem:[%s4649_s15 + $0x18] sm:$0xff]  }
 0xf7e   : > { %3790 = vmatprep.subr.bf16.mxu0 %v4069_v43 }
 0xf81   : > { %3791 = vmatpush3.bf16.msra.mxu0 %v3970_v44 }
 0xf82   : > { %3792 = vmatprep.subr.bf16.mxu0 %v4069_v43 }
 0xf85   : > { %3793 = vmatpush3.bf16.msra.mxu0 %v3971_v54 }
 0xf86   : > { %3794 = vmatprep.subr.bf16.mxu0 %v4069_v43 }
 0xf89   : > { %3795 = vmatpush3.bf16.msra.mxu0 %v3972_v55 }
 0xf8a   : > { %3812 = vmatprep.subr.bf16.mxu0 %v4069_v43 }
 0xf8d   : > { %2884 = vadd.xlane.f32.xlu1 %v2883_v42 }
 0xf9e   : > { %2889 = vrot.lane.b32.xlu1 %v4506_v21, %s4077_s28  ;;  %s4655_s28 = sld [smem:[#allocation13_spill]] }
 0xfe5   : > { %v2650_v16 = vpop.xlane.xlu1 %2649 }
 0xfe6   : > { %v2539_v15 = vpop.xlane.xlu0 %2538 }
 0xfe7   : > { %4017 = vrcp.f32 %v2539_v15 }
 0xfe8   : > { %4019 = vrcp.f32 %v2650_v16 }
 0xfe9   : > { %v2773_v29 = vpop.permute.xlu1 %2772 }
 0xfea   : > { %v2778_v25 = vsel %vm1629_vm3, %v2773_v29, 0 }
 0xfed   : > { %v2768_v17 = vpop.xlane.xlu0 %2767 }
 0xfee   : > { %4021 = vrcp.f32 %v2768_v17 }
 0xff1   : > { %v4018_v18 = vpop.eup %4017  ;;  %v2656_v20 = vpop.permute.xlu0 %2655 }
 0xff2   : > { %v2541_v19 = vmul.f32 %v4018_v18, %v4012_v7  ;;  %v4020_v41 = vpop.eup %4019  ;;  %v2661_v52 = vsel %vm1629_vm3, %v2656_v20, 0 }
 0xff3   : > { %v2652_v21 = vmul.f32 %v4020_v41, %v4010_v5 }
 0xff4   : > { %v2542_v22 = vpack.c.bf16 %v2541_v19, %v2541_v19 }
 0xff5   : > { %v2653_v23 = vpack.c.bf16 %v2652_v21, %v2652_v21 }
 0xff6   : > { %3749 = vmatmul.mubr.msk.bf16.vlgmr.msra.gmra.mrb[44].mxu1 %vm1613_vm5, %v2542_v22 }
 0xff7   : > { %3759 = vmatpush3.bf16.msra.mxu1 %v2661_v52  ;;  %3760 = vmatprep.mubr.msk.bf16.mxu1 %vm4070_vm1, %v4069_v43  ;;  %v3491_v52 = vld [vmem:[%s4653_s23] ss:$0 sm:$0xff] }
 0xff8   : > { %3770 = vmatprep.subr.bf16.mxu1 %v4069_v43  ;;  %v4022_v24 = vpop.eup %4021 }
 0xff9   : > { %v2770_v26 = vmul.f32 %v4022_v24, %v4014_v8 }
 0xffb   : > { %v2771_v27 = vpack.c.bf16 %v2770_v26, %v2770_v26 }
 0xffe   : > { %3761 = vmatmul.mubr.msk.bf16.vlgmr.msra.gmra.mrb[48].mxu1 %vm1613_vm5, %v2653_v23 }
 0xfff   : > { %3771 = vmatpush3.bf16.msra.mxu1 %v2778_v25  ;;  %3772 = vmatprep.mubr.msk.bf16.mxu1 %vm4070_vm1, %v4069_v43 }
0x1000   : > { %3782 = vmatprep.subr.bf16.mxu1 %v4069_v43 }
0x1006   : > { %3773 = vmatmul.mubr.msk.bf16.vlgmr.msra.gmra.mrb[52].mxu1 %vm1613_vm5, %v2771_v27 }
0x1007   : > { %3784 = vmatprep.mubr.msk.bf16.mxu1 %vm4070_vm1, %v4069_v43 }
0x101a   : > { %v2885_v28 = vpop.xlane.xlu1 %2884 }
0x101b   : > { %4023 = vrcp.f32 %v2885_v28 }
0x101e   : > { %v2890_v30 = vpop.permute.xlu1 %2889 }
0x101f   : > { %v2895_v31 = vsel %vm1629_vm3, %v2890_v30, 0 }
0x1020   : > { %3783 = vmatpush3.bf16.msra.mxu1 %v2895_v31 }
0x1021   : > { %3800 = vmatprep.subr.bf16.mxu1 %v4069_v43 }
0x1025   : > { %v4024_v32 = vpop.eup %4023 }
0x1026   : > { %v2887_v33 = vmul.f32 %v4024_v32, %v4016_v13  ;;  %v3493_v32 = vld [vmem:[%s4655_s28] ss:$0 sm:$0xff] }
0x1028   : > { %v2888_v34 = vpack.c.bf16 %v2887_v33, %v2887_v33 }
0x102a   : > { %3785 = vmatmul.mubr.msk.bf16.vlgmr.msra.gmra.mrb[56].mxu1 %vm1613_vm5, %v2888_v34 }
0x102b   : > { %3808 = vmatprep.mubr.msk.bf16.mxu1 %vm4070_vm1, %v4069_v43 }
0x10c9   : > { %v2583_v35 = vpop.f32.mrb[44].mxu1 }
0x10ca   : > { %2589 = vst.msk [vmem:[#allocation2] sm:$0xff] %vm1564_vm2, %v2583_v35  ;;  %v3750_v36 = vpop.f32.mrb[45].mxu1 }
0x10cb   : > { %v2586_v37 = vpop.f32.mrb[46].mxu1 }
0x10cc   : > { %v3751_v38 = vpop.f32.mrb[47].mxu1 }
0x10d1   : > { %v2697_v45 = vpop.f32.mrb[48].mxu1 }
0x10d2   : > { %2704 = vrot.lane.b32.xlu0 %v2697_v45, %s4076_s26  ;;  %v3762_v46 = vpop.f32.mrb[49].mxu1  ;;  %s4654_s26 = sld [smem:[#allocation11_spill]] }
0x10d3   : > { %v2700_v47 = vpop.f32.mrb[50].mxu1 }
0x10d4   : > { %v3763_v48 = vpop.f32.mrb[51].mxu1 }
0x10d5   : > { %v3499_v48 = vld [vmem:[%s4217_s12] ss:$0 sm:$0xff] }
0x10d8   : > { %v3492_v29 = vld [vmem:[%s4654_s26] ss:$0 sm:$0xff] }
0x10d9   : > { %v2814_v49 = vpop.f32.mrb[52].mxu1 }
0x10da   : > { %2821 = vrot.lane.b32.xlu1 %v2814_v49, %s4074_s22  ;;  %v3774_v50 = vpop.f32.mrb[53].mxu1  ;;  %s4652_s22 = sld [smem:[#allocation14_spill]] }
0x10db   : > { %v2817_v51 = vpop.f32.mrb[54].mxu1 }
0x10dc   : > { %v3775_v53 = vpop.f32.mrb[55].mxu1 }
0x10e0   : > { %v3977_v16 = vld [vmem:[%s4652_s22] sm:$0xff]   ;;  %v3978_v17 = vld [vmem:[%s4652_s22 + $0x8] sm:$0xff]   ;;  %v3979_v18 = vld [vmem:[%s4652_s22 + $0x10] sm:$0xff]  }
0x10e1   : > { %v3980_v26 = vld [vmem:[%s4652_s22 + $0x18] sm:$0xff]   ;;  %v3981_v27 = vld [vmem:[%s4652_s22 + $0x20] sm:$0xff]   ;;  %v3982_v28 = vld [vmem:[%s4652_s22 + $0x28] sm:$0xff]  }
0x10e2   : > { %v3983_v30 = vld [vmem:[%s4652_s22 + $0x30] sm:$0xff]   ;;  %v3984_v31 = vld [vmem:[%s4652_s22 + $0x38] sm:$0xff]  }
0x10fd   : > { %v2931_v56 = vpop.f32.mrb[56].mxu1 }
0x10fe   : > { %2938 = vrot.lane.b32.xlu0 %v2931_v56, %s4073_s18  ;;  %v3786_v57 = vpop.f32.mrb[57].mxu1  ;;  %s4651_s18 = sld [smem:[#allocation12_spill]] }
0x10ff   : > { %v2934_v59 = vpop.f32.mrb[58].mxu1 }
0x1100   : > { %v3787_v60 = vpop.f32.mrb[59].mxu1 }
0x1104   : > { %v3973_v13 = vld [vmem:[%s4651_s18] sm:$0xff]   ;;  %v3975_v42 = vld [vmem:[%s4651_s18 + $0x10] sm:$0xff]   ;;  %v3976_v15 = vld [vmem:[%s4651_s18 + $0x18] sm:$0xff]  }
0x1105   : > { %3801 = vmatpush3.bf16.msra.mxu1 %v3973_v13 }
0x1106   : > { %3802 = vmatprep.subr.bf16.mxu1 %v4069_v43 }
0x1144   : > { %v2705_v61 = vpop.permute.xlu0 %2704 }
0x1145   : > { %2707 = vst.msk [vmem:[#allocation2] sm:$0xff] %vm1791_vm6, %v2705_v61 }
0x114c   : > { %v2822_v62 = vpop.permute.xlu1 %2821 }
0x114d   : > { %2824 = vst.msk [vmem:[#allocation2] sm:$0xff] %vm1909_vm7, %v2822_v62 }
0x1170   : > { %v2939_v63 = vpop.permute.xlu0 %2938 }
0x1171   : > { %2941 = vst.msk [vmem:[#allocation2] sm:$0xff] %vm2027_vm8, %v2939_v63 }
0x1178   : > { %v2942_v0 = vld [vmem:[#allocation2] sm:$0xff] }
0x1179   : > { %v2943_v1 = vpack.c.bf16 %v2942_v0, %v2942_v0 }
0x117b   : > { %3797 = vmatmul.mubr.msk.bf16.vlgmr.msra.gmra.mrb[36].mxu0 %vm1425_vm0, %v2943_v1 }
0x117c   : > { %3828 = vmatprep.mubr.msk.bf16.mxu0 %vm4070_vm1, %v4069_v43  ;;  %3813 = vmatpush3.bf16.msra.mxu0 %v3977_v16 }
0x117d   : > { %3814 = vmatprep.subr.bf16.mxu0 %v4069_v43 }
0x1180   : > { %3815 = vmatpush3.bf16.msra.mxu0 %v3978_v17 }
0x1181   : > { %3816 = vmatprep.subr.bf16.mxu0 %v4069_v43 }
0x1184   : > { %3817 = vmatpush3.bf16.msra.mxu0 %v3979_v18 }
0x1185   : > { %3818 = vmatprep.subr.bf16.mxu0 %v4069_v43 }
0x1188   : > { %3819 = vmatpush3.bf16.msra.mxu0 %v3980_v26 }
0x1189   : > { %3820 = vmatprep.subr.bf16.mxu0 %v4069_v43 }
0x118c   : > { %3821 = vmatpush3.bf16.msra.mxu0 %v3981_v27 }
0x118d   : > { %3822 = vmatprep.subr.bf16.mxu0 %v4069_v43 }
0x1190   : > { %3823 = vmatpush3.bf16.msra.mxu0 %v3982_v28 }
0x1191   : > { %3824 = vmatprep.subr.bf16.mxu0 %v4069_v43 }
0x1194   : > { %3825 = vmatpush3.bf16.msra.mxu0 %v3983_v30 }
0x1195   : > { %3826 = vmatprep.subr.bf16.mxu0 %v4069_v43 }
0x1198   : > { %3827 = vmatpush3.bf16.msra.mxu0 %v3984_v31 }
0x124e   : > { %v3020_v2 = vpop.f32.mrb[36].mxu0 }
0x124f   : > { %v3021_v3 = vadd.f32 %v3485_v14, %v3020_v2  ;;  %v3798_v4 = vpop.f32.mrb[37].mxu0  ;;  %v3508_v14 = vld [vmem:[%s4222_s20] ss:$0 sm:$0xff] }
0x1250   : > { %v3023_v5 = vpop.f32.mrb[38].mxu0 }
0x1251   : > { %v4583_v7 = vadd.f32 %v3021_v3, %v4470_v40  ;;  %v3799_v58 = vpop.f32.mrb[39].mxu0  ;;  %v3974_v40 = vld [vmem:[%s4651_s18 + $0x8] sm:$0xff]   ;;  %v3509_v3 = vld [vmem:[%s4227_s27] ss:$0 sm:$0xff] }
0x1252   : > { %3803 = vmatpush3.bf16.msra.mxu1 %v3974_v40 }
0x1253   : > { %v3029_v6 = vsel %vm1425_vm0, %v4583_v7, 0.0  ;;  %3804 = vmatprep.subr.bf16.mxu1 %v4069_v43 }
0x1254   : > { %3030 = vadd.xlane.f32.xlu1 %v3029_v6 }
0x1256   : > { %3805 = vmatpush3.bf16.msra.mxu1 %v3975_v42 }
0x1257   : > { %3806 = vmatprep.subr.bf16.mxu1 %v4069_v43 }
0x125a   : > { %3807 = vmatpush3.bf16.msra.mxu1 %v3976_v15 }
0x12e1   : > { %v3031_v8 = vpop.xlane.xlu1 %3030 }
0x12e2   : > { %v3032_v9 = vmul.f32 0.015625, %v3031_v8 }
0x12e4   : > { %v3033_v10 = vsub.f32 %v4583_v7, %v3032_v9 }
0x12e6   : > { %v3034_v11 = vmul.f32 %v3033_v10, %v3033_v10 }
0x12e8   : > { %v3035_v12 = vsel %vm1425_vm0, %v3034_v11, 0.0 }
0x12e9   : > { %3036 = vadd.xlane.f32.xlu0 %v3035_v12 }
0x1376   : > { %v3037_v19 = vpop.xlane.xlu0 %3036 }
0x1377   : > { %v3038_v20 = vmul.f32 0.015625, %v3037_v19 }
0x1379   : > { %v3039_v22 = vadd.f32 1e-06, %v3038_v20 }
0x137b   : > { %4025 = vrsqrt.f32 %v3039_v22 }
0x1385   : > { %v4026_v41 = vpop.eup %4025 }
0x1386   : > { %v3041_v21 = vmul.f32 %v4026_v41, %v3033_v10 }
0x1388   : > { %v3048_v23 = vmul.f32 %v3491_v52, %v3041_v21 }
0x138a   : > { %v3055_v24 = vadd.f32 %v3492_v29, %v3048_v23 }
0x138c   : > { %v3056_v25 = vpack.c.bf16 %v3055_v24, %v3055_v24 }
0x138e   : > { %3809 = vmatmul.mubr.msk.bf16.vlgmr.msra.gmra.mrb[60].mxu1 %vm1425_vm0, %v3056_v25 }
0x1461   : > { %v3133_v33 = vpop.f32.mrb[60].mxu1 }
0x1462   : > { %v3134_v34 = vadd.f32 %v3493_v32, %v3133_v33  ;;  %v3810_v35 = vpop.f32.mrb[61].mxu1 }
0x1463   : > { %v3136_v36 = vpop.f32.mrb[62].mxu1 }
0x1464   : > { %v3140_v37 = vmul.f32 0.70710677, %v3134_v34  ;;  %v3811_v38 = vpop.f32.mrb[63].mxu1  ;;  %v3139_v44 = vmul.f32 0.5, %v3134_v34 }
0x1466   : > { %4027 = verf.f32 %v3140_v37 }
0x1470   : > { %v4028_v39 = vpop.eup %4027 }
0x1471   : > { %v3142_v45 = vadd.f32 1.0, %v4028_v39 }
0x1473   : > { %v3143_v46 = vmul.f32 %v3142_v45, %v3139_v44 }
0x1475   : > { %v3144_v47 = vpack.c.bf16 %v3143_v46, %v3143_v46 }
0x1477   : > { %3829 = vmatmul.mubr.bf16.vlgmr.msra.gmra.mrb[40].mxu0 %v3144_v47 }
0x154a   : > { %v3250_v49 = vpop.f32.mrb[40].mxu0 }
0x154b   : > { %v3251_v43 = vadd.f32 %v3499_v48, %v3250_v49  ;;  %v3830_v50 = vpop.f32.mrb[41].mxu0 }
0x154c   : > { %v3253_v51 = vpop.f32.mrb[42].mxu0 }
0x154d   : > { %v3831_v53 = vpop.f32.mrb[43].mxu0  ;;  %v3256_v54 = vadd.f32 %v3251_v43, %v4583_v7 }
0x154f   : > { %v3259_v55 = vsel %vm1425_vm0, %v3256_v54, 0.0 }
0x1550   : > { %3260 = vadd.xlane.f32.xlu0 %v3259_v55 }
0x15dd   : > { %v3261_v56 = vpop.xlane.xlu0 %3260 }
0x15de   : > { %v3262_v57 = vmul.f32 0.015625, %v3261_v56 }
0x15e0   : > { %v3263_v59 = vsub.f32 %v3256_v54, %v3262_v57 }
0x15e2   : > { %v3264_v60 = vmul.f32 %v3263_v59, %v3263_v59 }
0x15e4   : > { %v3265_v61 = vsel %vm1425_vm0, %v3264_v60, 0.0 }
0x15e5   : > { %3266 = vadd.xlane.f32.xlu1 %v3265_v61 }
0x1672   : > { %v3267_v62 = vpop.xlane.xlu1 %3266 }
0x1673   : > { %v3268_v63 = vmul.f32 0.015625, %v3267_v62 }
0x1675   : > { %v3269_v0 = vadd.f32 1e-06, %v3268_v63 }
0x1677   : > { %4029 = vrsqrt.f32 %v3269_v0 }
0x1681   : > { %v4030_v1 = vpop.eup %4029 }
0x1682   : > { %v3271_v2 = vmul.f32 %v4030_v1, %v3263_v59 }
0x1684   : > { %v3278_v4 = vmul.f32 %v3508_v14, %v3271_v2 }
0x1686   : > { %v3285_v5 = vadd.f32 %v3509_v3, %v3278_v4 }
0x1688   : > { %3286 = vst.msk [vmem:[%s900_s11] sm:$0xff] %vm1425_vm0, %v3285_v5 }
0x1689 PF: > { %s69_s7 = sadd.s32 1, %s4037_s7  }
0x168a   : > { %p66_p4 = scmp.ge.s32.totalorder %s69_s7, 4  }
0x168c   :  { %68 = sbr.rel (!%p66_p4) target bundleno = 49 (0x31), region = 195 }

</bundles_post_ra>
